<compile_context>
chip_gen: v5e
topology: v5e:2x2
jax: 0.10.0
libtpu: 0.0.40
codegen_flags: <defaults>
</compile_context>

<pallas_src>
import functools

import jax
import jax.numpy as jnp
from jax.experimental import pallas as pl
from jax.experimental.pallas import tpu as pltpu

N_INPUT = 2
N_HIDDEN = 256
N_OUTPUT = 3
K_PAD = 8         # padded input-feature width (sublane granularity) for the MXU
N_OUT_PAD = 128   # lane-dense padded output width (multiple of 128)


def _mlp_kernel(x_ref,
                w1_ref, b1_ref,
                w2_ref, b2_ref,
                w3_ref, b3_ref,
                w4_ref, b4_ref,
                o_ref):
    """Fused MLP: 4 MXU matmuls (f32 accumulation), ReLU x3, sigmoid, one store."""
    x = x_ref[...]                                           # (bb, K_PAD)

    # --- layer 1: padded K=8 MXU pass (MXU is idle here; the zero pass is free).
    h = jnp.dot(x.astype(w1_ref.dtype), w1_ref[...],
                preferred_element_type=jnp.float32)
    h = jnp.maximum(h + b1_ref[...].astype(jnp.float32), 0.0)

    # --- layers 2 & 3: 256x256 MXU matmuls (weights may be bf16), f32 accumulate.
    h = jnp.dot(h.astype(w2_ref.dtype), w2_ref[...],
                preferred_element_type=jnp.float32)
    h = jnp.maximum(h + b2_ref[...].astype(jnp.float32), 0.0)

    h = jnp.dot(h.astype(w3_ref.dtype), w3_ref[...],
                preferred_element_type=jnp.float32)
    h = jnp.maximum(h + b3_ref[...].astype(jnp.float32), 0.0)

    # --- layer 4: output padded to 128 lanes -> full-vreg math + unmasked store.
    y = jnp.dot(h.astype(w4_ref.dtype), w4_ref[...],
                preferred_element_type=jnp.float32)
    y = y + b4_ref[...].astype(jnp.float32)

    # sigmoid(y) = 1 / (1 + exp(-y)); exp and approx-reciprocal both ride the EUP slot.
    y = pl.reciprocal(1.0 + jnp.exp(-y), approx=True)

    o_ref[...] = y.astype(o_ref.dtype)


def _round_up(n, m):
    return ((n + m - 1) // m) * m


def _choose_block_b(B, block_b):
    """Batch tile: multiple of 8, clipped to the batch. For large batches prefer
    multiples of 256 (fills the 256-wide v6e/v7x MXU) and keep the grid at >= 4
    steps so both v7x TensorCores get >= 2 iterations each (DMA stays overlapped)."""
    bb = min(block_b, _round_up(B, 8))
    bb = max(8, (bb // 8) * 8)
    if B >= 4 * 256 and block_b >= 256:
        bb = max(256, (bb // 256) * 256)
        while _round_up(B, bb) // bb < 4 and bb >= 512:
            bb = max(256, ((bb // 2) // 256) * 256)
    return bb


def prepare_params(params, mxu_dtype=None):
    """One-time parameter prep, hoisted out of the per-call jitted path:
      * w1 zero-padded (2,256) -> (K_PAD,256) so layer 1 is one MXU pass
      * w4/b4 zero-padded to N_OUT_PAD lanes for an unmasked lane-dense store
      * optional cast of MXU-facing weights to `mxu_dtype` (bf16 is full-rate on
        the MXU of v5e, v6e and v7x; accumulation stays f32). Biases stay f32."""
    p = dict(params)
    p["w1"] = jnp.pad(params["w1"], ((0, K_PAD - params["w1"].shape[0]), (0, 0)))
    p["w4"] = jnp.pad(params["w4"], ((0, 0), (0, N_OUT_PAD - params["w4"].shape[1])))
    p["b4"] = jnp.pad(params["b4"], ((0, 0), (0, N_OUT_PAD - params["b4"].shape[1])))
    if mxu_dtype is not None:
        for name in ("w1", "w2", "w3", "w4"):
            p[name] = p[name].astype(mxu_dtype)
    return p


@functools.partial(jax.jit, static_argnames=("block_b", "out_dtype"))
def mlp_forward(x, prepared, block_b=512, out_dtype=None):
    """x: (B, 2) float32; prepared: output of prepare_params()."""
    B = x.shape[0]
    out_dtype = x.dtype if out_dtype is None else out_dtype

    bb = _choose_block_b(B, block_b)
    Bp = _round_up(B, bb)
    # Single pad: batch rows up to the tile grid, features 2 -> K_PAD lanes.
    x_pad = jnp.pad(x, ((0, Bp - B), (0, K_PAD - x.shape[1])))

    w1, b1 = prepared["w1"], prepared["b1"]
    w2, b2 = prepared["w2"], prepared["b2"]
    w3, b3 = prepared["w3"], prepared["b3"]
    w4, b4 = prepared["w4"], prepared["b4"]

    # Full-array blocks with constant index_map -> weights resident in VMEM
    # across the grid (no per-step re-DMA).
    full2d = lambda arr: pl.BlockSpec(arr.shape, lambda i: (0, 0))

    grid = (Bp // bb,)
    out = pl.pallas_call(
        _mlp_kernel,
        out_shape=jax.ShapeDtypeStruct((Bp, N_OUT_PAD), out_dtype),
        grid_spec=pltpu.PrefetchScalarGridSpec(
            num_scalar_prefetch=0,
            grid=grid,
            in_specs=[
                pl.BlockSpec((bb, K_PAD), lambda i: (i, 0)),
                full2d(w1), full2d(b1),
                full2d(w2), full2d(b2),
                full2d(w3), full2d(b3),
                full2d(w4), full2d(b4),
            ],
            out_specs=pl.BlockSpec((bb, N_OUT_PAD), lambda i: (i, 0)),
        ),
        compiler_params=pltpu.CompilerParams(
            dimension_semantics=("parallel",)),
    )(x_pad, w1, b1, w2, b2, w3, b3, w4, b4)

    return out[:B, :N_OUTPUT]


def init_params(key):
    """Deterministic init mimicking nn.Linear defaults (U(-1/sqrt(fan_in), +))."""
    dims = [(N_INPUT, N_HIDDEN),
            (N_HIDDEN, N_HIDDEN),
            (N_HIDDEN, N_HIDDEN),
            (N_HIDDEN, N_OUTPUT)]
    params = {}
    for idx, (fan_in, fan_out) in enumerate(dims, start=1):
        key, kw, kb = jax.random.split(key, 3)
        bound = 1.0 / jnp.sqrt(float(fan_in))
        # Stored already transposed: (in_features, out_features).
        params[f"w{idx}"] = jax.random.uniform(
            kw, (fan_in, fan_out), jnp.float32, -bound, bound)
        # Bias kept 2D (1, out) for clean TPU layout / broadcasting.
        params[f"b{idx}"] = jax.random.uniform(
            kb, (1, fan_out), jnp.float32, -bound, bound)
    return params


def mlp_reference(x, params):
    """Pure-JAX (f32) reference for correctness checking (raw, unprepared params)."""
    h = jnp.maximum(x @ params["w1"].astype(jnp.float32) + params["b1"], 0.0)
    h = jnp.maximum(h @ params["w2"].astype(jnp.float32) + params["b2"], 0.0)
    h = jnp.maximum(h @ params["w3"].astype(jnp.float32) + params["b3"], 0.0)
    return jax.nn.sigmoid(h @ params["w4"].astype(jnp.float32) + params["b4"])


if __name__ == "__main__":
    key = jax.random.PRNGKey(0)
    key, kx = jax.random.split(key)

    B = 256  # batch of normalized uv pixel coords
    x = jax.random.uniform(kx, (B, N_INPUT), jnp.float32)  # (B, 2) in [0, 1)
    params = init_params(key)
    ref = mlp_reference(x, params)

    # f32-weight path; block_b=128 -> 2 parallel grid steps for this small demo batch.
    prepped_f32 = prepare_params(params)
    out = jax.block_until_ready(mlp_forward(x, prepped_f32, block_b=128))
    assert out.shape == (B, N_OUTPUT), out.shape
    assert jnp.allclose(out, ref, atol=2e-3, rtol=2e-3), (  # approx vrcp in sigmoid
        f"max abs err {jnp.max(jnp.abs(out - ref))}")

    # Tiny / non-multiple-of-tile batch exercises the padding path.
    out_small = jax.block_until_ready(mlp_forward(x[:6], prepped_f32))
    assert out_small.shape == (6, N_OUTPUT), out_small.shape
    assert jnp.allclose(out_small, ref[:6], atol=2e-3, rtol=2e-3), (
        f"max abs err {jnp.max(jnp.abs(out_small - ref[:6]))}")

    # bf16 MXU-weight path (full MXU rate on v5e/v6e/v7x) + bf16 output stream
    # (halves the dominant HBM write on v6e). Looser tolerance vs the f32 reference.
    prepped_bf16 = prepare_params(params, mxu_dtype=jnp.bfloat16)
    out_bf16 = jax.block_until_ready(
        mlp_forward(x, prepped_bf16, block_b=128, out_dtype=jnp.bfloat16))
    assert out_bf16.shape == (B, N_OUTPUT), out_bf16.shape
    assert jnp.allclose(out_bf16.astype(jnp.float32), ref, atol=5e-2, rtol=5e-2), (
        f"max abs err {jnp.max(jnp.abs(out_bf16.astype(jnp.float32) - ref))}")

    # Larger batch exercises the multiple-of-256, >=4-grid-step tiling.
    key, kx2 = jax.random.split(key)
    xl = jax.random.uniform(kx2, (2048, N_INPUT), jnp.float32)
    refl = mlp_reference(xl, params)
    out_l = jax.block_until_ready(mlp_forward(xl, prepped_f32))
    assert out_l.shape == (2048, N_OUTPUT), out_l.shape
    assert jnp.allclose(out_l, refl, atol=2e-3, rtol=2e-3), (
        f"max abs err {jnp.max(jnp.abs(out_l - refl))}")

    print("KERNEL_OK")
</pallas_src>

<mosaic_0001>
module attributes {stable_mosaic.version = 11 : i64} {
  func.func @_mlp_kernel(%arg0: i32, %arg1: memref<128x8xf32, #tpu.memory_space<vmem>>, %arg2: memref<8x256xf32, #tpu.memory_space<vmem>>, %arg3: memref<1x256xf32, #tpu.memory_space<vmem>>, %arg4: memref<256x256xf32, #tpu.memory_space<vmem>>, %arg5: memref<1x256xf32, #tpu.memory_space<vmem>>, %arg6: memref<256x256xf32, #tpu.memory_space<vmem>>, %arg7: memref<1x256xf32, #tpu.memory_space<vmem>>, %arg8: memref<256x128xf32, #tpu.memory_space<vmem>>, %arg9: memref<1x128xf32, #tpu.memory_space<vmem>>, %arg10: memref<128x128xf32, #tpu.memory_space<vmem>>) attributes {dimension_semantics = [#tpu.dimension_semantics<parallel>], iteration_bounds = array<i64: 2>, scalar_prefetch = 0 : i64, scratch_operands = 0 : i64, tpu.core_type = #tpu.core_type<tc>, window_params = [{transform_indices = @transform_0, window_bounds = array<i64: 128, 8>}, {pipeline_mode = #tpu.pipeline_mode<synchronous>, transform_indices = @transform_1, window_bounds = array<i64: 8, 256>}, {pipeline_mode = #tpu.pipeline_mode<synchronous>, transform_indices = @transform_2, window_bounds = array<i64: 1, 256>}, {pipeline_mode = #tpu.pipeline_mode<synchronous>, transform_indices = @transform_3, window_bounds = array<i64: 256, 256>}, {pipeline_mode = #tpu.pipeline_mode<synchronous>, transform_indices = @transform_4, window_bounds = array<i64: 1, 256>}, {pipeline_mode = #tpu.pipeline_mode<synchronous>, transform_indices = @transform_5, window_bounds = array<i64: 256, 256>}, {pipeline_mode = #tpu.pipeline_mode<synchronous>, transform_indices = @transform_6, window_bounds = array<i64: 1, 256>}, {pipeline_mode = #tpu.pipeline_mode<synchronous>, transform_indices = @transform_7, window_bounds = array<i64: 256, 128>}, {pipeline_mode = #tpu.pipeline_mode<synchronous>, transform_indices = @transform_8, window_bounds = array<i64: 1, 128>}, {transform_indices = @transform_9, window_bounds = array<i64: 128, 128>}]} {
    %c0 = arith.constant 0 : index
    %c0_0 = arith.constant 0 : index
    %0 = vector.load %arg1[%c0, %c0_0] : memref<128x8xf32, #tpu.memory_space<vmem>>, vector<128x8xf32>
    %c0_1 = arith.constant 0 : index
    %c0_2 = arith.constant 0 : index
    %1 = vector.load %arg2[%c0_1, %c0_2] : memref<8x256xf32, #tpu.memory_space<vmem>>, vector<8x256xf32>
    %cst = arith.constant dense<0.000000e+00> : vector<128x256xf32>
    %2 = tpu.matmul %0, %1, %cst {dimension_numbers = #tpu.dot_dimension_numbers<[1], [0], [0], [1], [0, 0, 1, 1], [], []>} : vector<128x8xf32>, vector<8x256xf32>, vector<128x256xf32> -> vector<128x256xf32>
    %c0_3 = arith.constant 0 : index
    %c0_4 = arith.constant 0 : index
    %3 = vector.load %arg3[%c0_3, %c0_4] : memref<1x256xf32, #tpu.memory_space<vmem>>, vector<1x256xf32>
    %4 = vector.broadcast %3 : vector<1x256xf32> to vector<128x256xf32>
    %5 = arith.addf %2, %4 : vector<128x256xf32>
    %cst_5 = arith.constant 0.000000e+00 : f32
    %6 = vector.broadcast %cst_5 : f32 to vector<128x256xf32>
    %7 = arith.maximumf %5, %6 : vector<128x256xf32>
    %c0_6 = arith.constant 0 : index
    %c0_7 = arith.constant 0 : index
    %8 = vector.load %arg4[%c0_6, %c0_7] : memref<256x256xf32, #tpu.memory_space<vmem>>, vector<256x256xf32>
    %cst_8 = arith.constant dense<0.000000e+00> : vector<128x256xf32>
    %9 = tpu.matmul %7, %8, %cst_8 {dimension_numbers = #tpu.dot_dimension_numbers<[1], [0], [0], [1], [0, 0, 1, 1], [], []>} : vector<128x256xf32>, vector<256x256xf32>, vector<128x256xf32> -> vector<128x256xf32>
    %c0_9 = arith.constant 0 : index
    %c0_10 = arith.constant 0 : index
    %10 = vector.load %arg5[%c0_9, %c0_10] : memref<1x256xf32, #tpu.memory_space<vmem>>, vector<1x256xf32>
    %11 = vector.broadcast %10 : vector<1x256xf32> to vector<128x256xf32>
    %12 = arith.addf %9, %11 : vector<128x256xf32>
    %cst_11 = arith.constant 0.000000e+00 : f32
    %13 = vector.broadcast %cst_11 : f32 to vector<128x256xf32>
    %14 = arith.maximumf %12, %13 : vector<128x256xf32>
    %c0_12 = arith.constant 0 : index
    %c0_13 = arith.constant 0 : index
    %15 = vector.load %arg6[%c0_12, %c0_13] : memref<256x256xf32, #tpu.memory_space<vmem>>, vector<256x256xf32>
    %cst_14 = arith.constant dense<0.000000e+00> : vector<128x256xf32>
    %16 = tpu.matmul %14, %15, %cst_14 {dimension_numbers = #tpu.dot_dimension_numbers<[1], [0], [0], [1], [0, 0, 1, 1], [], []>} : vector<128x256xf32>, vector<256x256xf32>, vector<128x256xf32> -> vector<128x256xf32>
    %c0_15 = arith.constant 0 : index
    %c0_16 = arith.constant 0 : index
    %17 = vector.load %arg7[%c0_15, %c0_16] : memref<1x256xf32, #tpu.memory_space<vmem>>, vector<1x256xf32>
    %18 = vector.broadcast %17 : vector<1x256xf32> to vector<128x256xf32>
    %19 = arith.addf %16, %18 : vector<128x256xf32>
    %cst_17 = arith.constant 0.000000e+00 : f32
    %20 = vector.broadcast %cst_17 : f32 to vector<128x256xf32>
    %21 = arith.maximumf %19, %20 : vector<128x256xf32>
    %c0_18 = arith.constant 0 : index
    %c0_19 = arith.constant 0 : index
    %22 = vector.load %arg8[%c0_18, %c0_19] : memref<256x128xf32, #tpu.memory_space<vmem>>, vector<256x128xf32>
    %cst_20 = arith.constant dense<0.000000e+00> : vector<128x128xf32>
    %23 = tpu.matmul %21, %22, %cst_20 {dimension_numbers = #tpu.dot_dimension_numbers<[1], [0], [0], [1], [0, 0, 1, 1], [], []>} : vector<128x256xf32>, vector<256x128xf32>, vector<128x128xf32> -> vector<128x128xf32>
    %c0_21 = arith.constant 0 : index
    %c0_22 = arith.constant 0 : index
    %24 = vector.load %arg9[%c0_21, %c0_22] : memref<1x128xf32, #tpu.memory_space<vmem>>, vector<1x128xf32>
    %25 = vector.broadcast %24 : vector<1x128xf32> to vector<128x128xf32>
    %26 = arith.addf %23, %25 : vector<128x128xf32>
    %cst_23 = arith.constant 0.000000e+00 : f32
    %27 = vector.broadcast %cst_23 : f32 to vector<128x128xf32>
    %28 = arith.subf %27, %26 : vector<128x128xf32>
    %29 = math.exp %28 : vector<128x128xf32>
    %cst_24 = arith.constant 1.000000e+00 : f32
    %30 = vector.broadcast %cst_24 : f32 to vector<128x128xf32>
    %31 = arith.addf %30, %29 : vector<128x128xf32>
    %32 = tpu.reciprocal %31 {approx = true} : vector<128x128xf32> -> vector<128x128xf32>
    %c0_25 = arith.constant 0 : index
    %c0_26 = arith.constant 0 : index
    %33 = vector.load %arg10[%c0_25, %c0_26] : memref<128x128xf32, #tpu.memory_space<vmem>>, vector<128x128xf32>
    tpu.vector_store %arg10[%c0_25, %c0_26], %32 {strides = array<i32>} : memref<128x128xf32, #tpu.memory_space<vmem>>, vector<128x128xf32>,
    return
  }
  func.func @transform_0(%arg0: i32) -> (i32, i32) {
    %c0_i32 = arith.constant 0 : i32
    %c0_i32_0 = arith.constant 0 : i32
    return %arg0, %c0_i32 : i32, i32
  }
  func.func @transform_1(%arg0: i32) -> (i32, i32) {
    %c0_i32 = arith.constant 0 : i32
    %c0_i32_0 = arith.constant 0 : i32
    %c0_i32_1 = arith.constant 0 : i32
    return %c0_i32, %c0_i32_0 : i32, i32
  }
  func.func @transform_2(%arg0: i32) -> (i32, i32) {
    %c0_i32 = arith.constant 0 : i32
    %c0_i32_0 = arith.constant 0 : i32
    %c0_i32_1 = arith.constant 0 : i32
    return %c0_i32, %c0_i32_0 : i32, i32
  }
  func.func @transform_3(%arg0: i32) -> (i32, i32) {
    %c0_i32 = arith.constant 0 : i32
    %c0_i32_0 = arith.constant 0 : i32
    %c0_i32_1 = arith.constant 0 : i32
    return %c0_i32, %c0_i32_0 : i32, i32
  }
  func.func @transform_4(%arg0: i32) -> (i32, i32) {
    %c0_i32 = arith.constant 0 : i32
    %c0_i32_0 = arith.constant 0 : i32
    %c0_i32_1 = arith.constant 0 : i32
    return %c0_i32, %c0_i32_0 : i32, i32
  }
  func.func @transform_5(%arg0: i32) -> (i32, i32) {
    %c0_i32 = arith.constant 0 : i32
    %c0_i32_0 = arith.constant 0 : i32
    %c0_i32_1 = arith.constant 0 : i32
    return %c0_i32, %c0_i32_0 : i32, i32
  }
  func.func @transform_6(%arg0: i32) -> (i32, i32) {
    %c0_i32 = arith.constant 0 : i32
    %c0_i32_0 = arith.constant 0 : i32
    %c0_i32_1 = arith.constant 0 : i32
    return %c0_i32, %c0_i32_0 : i32, i32
  }
  func.func @transform_7(%arg0: i32) -> (i32, i32) {
    %c0_i32 = arith.constant 0 : i32
    %c0_i32_0 = arith.constant 0 : i32
    %c0_i32_1 = arith.constant 0 : i32
    return %c0_i32, %c0_i32_0 : i32, i32
  }
  func.func @transform_8(%arg0: i32) -> (i32, i32) {
    %c0_i32 = arith.constant 0 : i32
    %c0_i32_0 = arith.constant 0 : i32
    %c0_i32_1 = arith.constant 0 : i32
    return %c0_i32, %c0_i32_0 : i32, i32
  }
  func.func @transform_9(%arg0: i32) -> (i32, i32) {
    %c0_i32 = arith.constant 0 : i32
    %c0_i32_0 = arith.constant 0 : i32
    return %arg0, %c0_i32 : i32, i32
  }
}

</mosaic_0001>

<bundles_post_ra>
// kernel: mlp_forward.1
= control target key start
LH: loop header
LB: loop body
LE: loop exit
PB: predicated region body
PF: predicated region fallthrough
CT: control target
= control target key end

     0   :  { %14 = vsyncpa [#allocation3], 0  ;;  %s2518_s0 = inlined_call_operand.vmem [shape: f32[256,8], index: 0, kind: input, shape index: {}]   ;;  %s2519_s1 = inlined_call_operand.hbm [shape: f32[8,256], index: 1, kind: input, shape index: {}]   ;;  %s2520_s2 = inlined_call_operand.vmem [shape: f32[1,256], index: 2, kind: input, shape index: {}]   ;;  %s2521_s3 = inlined_call_operand.vmem [shape: f32[256,256], index: 3, kind: input, shape index: {}]   ;;  %s2522_s4 = inlined_call_operand.vmem [shape: f32[1,256], index: 4, kind: input, shape index: {}]   ;;  %s2523_s5 = inlined_call_operand.hbm [shape: f32[256,256], index: 5, kind: input, shape index: {}]   ;;  %s2524_s6 = inlined_call_operand.vmem [shape: f32[1,256], index: 6, kind: input, shape index: {}]   ;;  %s2525_s7 = inlined_call_operand.vmem [shape: f32[256,128], index: 7, kind: input, shape index: {}]   ;;  %s2526_s8 = inlined_call_operand.vmem [shape: f32[1,128], index: 8, kind: input, shape index: {}]   ;;  %s2527_s9 = inlined_call_operand.vmem [shape: f32[256,128], index: 9, kind: output, shape index: {}]  }
   0x1   :  { %15 = vsyncpa [#allocation5], 0  ;;  %s1972_s30 = smov 0  }
   0x2 LB: > { %s258_s12 = sshll.u32 %s2519_s1, 4  ;;  %s1667_s13 = sadd.s32 4294967295, %s1916_s30   ;;  %s1916_s30 = sphi %s1972_s30, %s21_s30   ;;  %s259_s12 = int_to_ptr.hbm [resolvable:$true] %s258_s12 }
   0x3   : > { %p1669_p0 = scmp.ge.s32.totalorder %s1916_s30, 1  ;;  %p246_p1 = scmp.lt.s32.totalorder %s1916_s30, 3 }
   0x4   : > { %p1983_p2 = scmp.eq.s32.totalorder %s1667_s13, 0  ;;  %s1918_s16 = smov [#allocation2]  }
   0x5   : > { %p1987_p3 = pnand %p1669_p0, %p246_p1  ;;  %s260_s17 = sshll.u32 %s1918_s16, 4  ;;  %s261_s17 = int_to_ptr.vmem [resolvable:$true] %s260_s17 }
   0x6   : > { %s278_s20 = sshll.u32 %s2523_s5, 4  ;;  %s1919_s21 = smov [#allocation4]   ;;  %s279_s20 = int_to_ptr.hbm [resolvable:$true] %s278_s20 }
   0x7   : > { %p1754_p4 = pneg %p1987_p3  ;;  %s280_s22 = sshll.u32 %s1919_s21, 4  ;;  %s281_s22 = int_to_ptr.vmem [resolvable:$true] %s280_s22 }
   0x8   : > { %s1920_s23 = smov 256   ;;  %s1921_s24 = smov 16  }
   0x9   : > { %p1755_p5 = pnand %p1983_p2, %p1754_p4  ;;  %314 = sbr.rel (%p1987_p3) target bundleno = 707 (0x2c3), region = 56 }
   0xb   : > { %1757 = dma.hbm_to_vmem [thread:$0]  (!%p1755_p5), %s259_s12, 256, %s261_s17, [#allocation3]  }
   0xc   : > { %1760 = dma.hbm_to_vmem [thread:$0]  (!%p1755_p5), %s279_s20, 8192, %s281_s22, [#allocation5], %s1920_s23, %s1920_s23, %s1921_s24  }
   0xe   : > { %1907 = dma.done.wait (%p1983_p2), [#allocation3], 256  }
   0xf   : > { %1909 = vsyncadd (%p1983_p2), [#allocation3], 4294967040 }
  0x10   : > { %1911 = dma.done.wait (%p1983_p2), [#allocation5], 8192  }
  0x11   : > { %1913 = vsyncadd (%p1983_p2), [#allocation5], 4294959104  ;;  %s1676_s25 = sshll.u32 %s1667_s13, 4  ;;  %vm392_vm0 = vcmask 64512   ;;  %v384_v0 = vld [vmem:[#allocation2] sm:$0xff]  ;;  %v385_v2 = vld [vmem:[#allocation2 + $0x8] sm:$0xff] }
  0x12   : > { %p357_p6 = scmp.lt.s32.totalorder %s1676_s25, 31  ;;  %456 = vmatpush.msra.mxu0 %v384_v0  ;;  %521 = vmatpush.msra.mxu1 %v385_v2  ;;  %v634_v3 = vld [vmem:[%s2521_s3 + $0xf8] sm:$0xff]  ;;  %v632_v5 = vld [vmem:[%s2521_s3 + $0xe8] sm:$0xff]  ;;  %v633_v34 = vld [vmem:[%s2521_s3 + $0xf0] sm:$0xff] }
  0x13   : > { %v666_v4 = vld [vmem:[%s2521_s3 + $0x1f8] sm:$0xff]  ;;  %v664_v6 = vld [vmem:[%s2521_s3 + $0x1e8] sm:$0xff]  ;;  %673 = vmatpush.msra.mxu2 %v633_v34  ;;  %v631_v36 = vld [vmem:[%s2521_s3 + $0xe0] sm:$0xff] }
  0x14   : > { %s2531_s25 = smov (!%p357_p6, %s1676_s25), 31  ;;  %803 = vmatpush.msrb.mxu0 %v634_v3  ;;  %868 = vmatpush.msrb.mxu1 %v666_v4  ;;  %v630_v7 = vld [vmem:[%s2521_s3 + $0xd8] sm:$0xff]  ;;  %v628_v9 = vld [vmem:[%s2521_s3 + $0xc8] sm:$0xff]  ;;  %v665_v37 = vld [vmem:[%s2521_s3 + $0x1f0] sm:$0xff] }
  0x15   : > { %s1677_s26 = sshll.u32 %s2531_s25, 3  ;;  %v662_v8 = vld [vmem:[%s2521_s3 + $0x1d8] sm:$0xff]  ;;  %v660_v10 = vld [vmem:[%s2521_s3 + $0x1c8] sm:$0xff]  ;;  %738 = vmatpush.msra.mxu3 %v665_v37  ;;  %v629_v38 = vld [vmem:[%s2521_s3 + $0xd0] sm:$0xff]  ;;  %674 = vmatpush.msra.mxu2 %v631_v36 }
  0x16   : > { %s2016_s29 = scalar_lea.vmem %s2518_s0, %s1677_s26  ;;  %804 = vmatpush.msrb.mxu0 %v632_v5  ;;  %869 = vmatpush.msrb.mxu1 %v664_v6  ;;  %v626_v12 = vld [vmem:[%s2521_s3 + $0xb8] sm:$0xff]  ;;  %v624_v15 = vld [vmem:[%s2521_s3 + $0xa8] sm:$0xff]  ;;  %v663_v39 = vld [vmem:[%s2521_s3 + $0x1e0] sm:$0xff] }
  0x17   : > { %v368_v1 = vld [vmem:[%s2016_s29] sm:$0xff]  ;;  %v369_v11 = vld [vmem:[%s2016_s29 + $0x8] sm:$0xff]  ;;  %v658_v13 = vld [vmem:[%s2521_s3 + $0x1b8] sm:$0xff]  ;;  %739 = vmatpush.msra.mxu3 %v663_v39  ;;  %675 = vmatpush.msra.mxu2 %v629_v38 }
  0x18   : > { %1680 = vmatmul.msk.f32.vlgmr.msra.gmra.mxu0 %vm392_vm0, %v368_v1  ;;  %1696 = vmatmul.msk.f32.vlgmr.msra.gmra.mxu1 %vm392_vm0, %v368_v1  ;;  %v370_v14 = vld [vmem:[%s2016_s29 + $0x10] sm:$0xff]  ;;  %v656_v16 = vld [vmem:[%s2521_s3 + $0x1a8] sm:$0xff]  ;;  %v371_v17 = vld [vmem:[%s2016_s29 + $0x18] sm:$0xff] }
  0x19   : > { %805 = vmatpush.msrb.mxu0 %v630_v7  ;;  %870 = vmatpush.msrb.mxu1 %v662_v8  ;;  %v622_v18 = vld [vmem:[%s2521_s3 + $0x98] sm:$0xff]  ;;  %v372_v20 = vld [vmem:[%s2016_s29 + $0x20] sm:$0xff]  ;;  %v620_v21 = vld [vmem:[%s2521_s3 + $0x88] sm:$0xff] }
  0x1a   : > { %v654_v19 = vld [vmem:[%s2521_s3 + $0x198] sm:$0xff]  ;;  %v652_v22 = vld [vmem:[%s2521_s3 + $0x188] sm:$0xff]  ;;  %v374_v26 = vld [vmem:[%s2016_s29 + $0x30] sm:$0xff] }
  0x1b   : > { %806 = vmatpush.msrb.mxu0 %v628_v9  ;;  %871 = vmatpush.msrb.mxu1 %v660_v10  ;;  %v373_v23 = vld [vmem:[%s2016_s29 + $0x28] sm:$0xff]  ;;  %v618_v24 = vld [vmem:[%s2521_s3 + $0x78] sm:$0xff]  ;;  %v376_v32 = vld [vmem:[%s2016_s29 + $0x40] sm:$0xff] }
  0x1c   : > { %v650_v25 = vld [vmem:[%s2521_s3 + $0x178] sm:$0xff]  ;;  %v616_v27 = vld [vmem:[%s2521_s3 + $0x68] sm:$0xff]  ;;  %v627_v41 = vld [vmem:[%s2521_s3 + $0xc0] sm:$0xff] }
  0x1d   : > { %807 = vmatpush.msrb.mxu0 %v626_v12  ;;  %872 = vmatpush.msrb.mxu1 %v658_v13  ;;  %v648_v28 = vld [vmem:[%s2521_s3 + $0x168] sm:$0xff]  ;;  %v375_v29 = vld [vmem:[%s2016_s29 + $0x38] sm:$0xff]  ;;  %v661_v42 = vld [vmem:[%s2521_s3 + $0x1d0] sm:$0xff] }
  0x1e   : > { %v614_v30 = vld [vmem:[%s2521_s3 + $0x58] sm:$0xff]  ;;  %v612_v33 = vld [vmem:[%s2521_s3 + $0x48] sm:$0xff]  ;;  %676 = vmatpush.msra.mxu2 %v627_v41  ;;  %740 = vmatpush.msra.mxu3 %v661_v42  ;;  %v625_v44 = vld [vmem:[%s2521_s3 + $0xb0] sm:$0xff] }
  0x1f   : > { %808 = vmatpush.msrb.mxu0 %v624_v15  ;;  %873 = vmatpush.msrb.mxu1 %v656_v16  ;;  %v646_v31 = vld [vmem:[%s2521_s3 + $0x158] sm:$0xff]  ;;  %v644_v35 = vld [vmem:[%s2521_s3 + $0x148] sm:$0xff]  ;;  %v659_v45 = vld [vmem:[%s2521_s3 + $0x1c0] sm:$0xff] }
  0x20   : > { %1681 = vmatmul.msk.f32.gmra.mxu0 %vm392_vm0, %v369_v11  ;;  %1697 = vmatmul.msk.f32.gmra.mxu1 %vm392_vm0, %v369_v11  ;;  %v377_v40 = vld [vmem:[%s2016_s29 + $0x48] sm:$0xff]  ;;  %v610_v43 = vld [vmem:[%s2521_s3 + $0x38] sm:$0xff]  ;;  %v623_v47 = vld [vmem:[%s2521_s3 + $0xa0] sm:$0xff] }
  0x21   : > { %809 = vmatpush.msrb.mxu0 %v622_v18  ;;  %874 = vmatpush.msrb.mxu1 %v654_v19  ;;  %v642_v46 = vld [vmem:[%s2521_s3 + $0x138] sm:$0xff]  ;;  %v657_v48 = vld [vmem:[%s2521_s3 + $0x1b0] sm:$0xff]  ;;  %v655_v50 = vld [vmem:[%s2521_s3 + $0x1a0] sm:$0xff] }
  0x22   : > { %677 = vmatpush.msra.mxu2 %v625_v44  ;;  %741 = vmatpush.msra.mxu3 %v659_v45  ;;  %v621_v49 = vld [vmem:[%s2521_s3 + $0x90] sm:$0xff]  ;;  %v619_v52 = vld [vmem:[%s2521_s3 + $0x80] sm:$0xff]  ;;  %v608_v54 = vld [vmem:[%s2521_s3 + $0x28] sm:$0xff] }
  0x23   : > { %810 = vmatpush.msrb.mxu0 %v620_v21  ;;  %875 = vmatpush.msrb.mxu1 %v652_v22  ;;  %v378_v51 = vld [vmem:[%s2016_s29 + $0x50] sm:$0xff]  ;;  %v651_v56 = vld [vmem:[%s2521_s3 + $0x180] sm:$0xff]  ;;  %v640_v57 = vld [vmem:[%s2521_s3 + $0x128] sm:$0xff] }
  0x24   : > { %678 = vmatpush.msra.mxu2 %v623_v47  ;;  %742 = vmatpush.msra.mxu3 %v657_v48  ;;  %v653_v53 = vld [vmem:[%s2521_s3 + $0x190] sm:$0xff]  ;;  %v615_v58 = vld [vmem:[%s2521_s3 + $0x60] sm:$0xff]  ;;  %v379_v62 = vld [vmem:[%s2016_s29 + $0x58] sm:$0xff] }
  0x25   : > { %811 = vmatpush.msrb.mxu0 %v618_v24  ;;  %876 = vmatpush.msrb.mxu1 %v650_v25  ;;  %v617_v55 = vld [vmem:[%s2521_s3 + $0x70] sm:$0xff]  ;;  %v647_v61 = vld [vmem:[%s2521_s3 + $0x160] sm:$0xff]  ;;  %v606_v1 = vld [vmem:[%s2521_s3 + $0x18] sm:$0xff] }
  0x26   : > { %679 = vmatpush.msra.mxu2 %v621_v49  ;;  %743 = vmatpush.msra.mxu3 %v655_v50  ;;  %v649_v59 = vld [vmem:[%s2521_s3 + $0x170] sm:$0xff]  ;;  %v611_v63 = vld [vmem:[%s2521_s3 + $0x40] sm:$0xff]  ;;  %v638_v4 = vld [vmem:[%s2521_s3 + $0x118] sm:$0xff] }
  0x27   : > { %812 = vmatpush.msrb.mxu0 %v616_v27  ;;  %877 = vmatpush.msrb.mxu1 %v648_v28  ;;  %v613_v60 = vld [vmem:[%s2521_s3 + $0x50] sm:$0xff]  ;;  %v643_v3 = vld [vmem:[%s2521_s3 + $0x140] sm:$0xff]  ;;  %v604_v12 = vld [vmem:[%s2521_s3 + $0x8] sm:$0xff] }
  0x28   : > { %1682 = vmatmul.msk.f32.gmra.mxu0 %vm392_vm0, %v370_v14  ;;  %1698 = vmatmul.msk.f32.gmra.mxu1 %vm392_vm0, %v370_v14  ;;  %v645_v0 = vld [vmem:[%s2521_s3 + $0x150] sm:$0xff]  ;;  %v607_v5 = vld [vmem:[%s2521_s3 + $0x20] sm:$0xff]  ;;  %v636_v14 = vld [vmem:[%s2521_s3 + $0x108] sm:$0xff] }
  0x29   : > { %813 = vmatpush.msrb.mxu0 %v614_v30  ;;  %878 = vmatpush.msrb.mxu1 %v646_v31  ;;  %v609_v2 = vld [vmem:[%s2521_s3 + $0x30] sm:$0xff]  ;;  %v380_v7 = vld [vmem:[%s2016_s29 + $0x60] sm:$0xff]  ;;  %v381_v15 = vld [vmem:[%s2016_s29 + $0x68] sm:$0xff] }
  0x2a   : > { %680 = vmatpush.msra.mxu2 %v619_v52  ;;  %744 = vmatpush.msra.mxu3 %v653_v53  ;;  %v641_v6 = vld [vmem:[%s2521_s3 + $0x130] sm:$0xff]  ;;  %v639_v9 = vld [vmem:[%s2521_s3 + $0x120] sm:$0xff]  ;;  %v383_v21 = vld [vmem:[%s2016_s29 + $0x78] sm:$0xff] }
  0x2b   : > { %814 = vmatpush.msrb.mxu0 %v612_v33  ;;  %879 = vmatpush.msrb.mxu1 %v644_v35  ;;  %v605_v8 = vld [vmem:[%s2521_s3 + $0x10] sm:$0xff]  ;;  %v603_v10 = vld [vmem:[%s2521_s3] sm:$0xff]  ;;  %v994_v28 = vld [vmem:[#allocation4 + $0xe8] sm:$0xff] }
  0x2c   : > { %681 = vmatpush.msra.mxu2 %v617_v55  ;;  %745 = vmatpush.msra.mxu3 %v651_v56  ;;  %v637_v11 = vld [vmem:[%s2521_s3 + $0x110] sm:$0xff]  ;;  %v635_v13 = vld [vmem:[%s2521_s3 + $0x100] sm:$0xff]  ;;  %v1026_v34 = vld [vmem:[#allocation4 + $0x1e8] sm:$0xff] }
  0x2d   : > { %815 = vmatpush.msrb.mxu0 %v610_v43  ;;  %880 = vmatpush.msrb.mxu1 %v642_v46  ;;  %v995_v16 = vld [vmem:[#allocation4 + $0xf0] sm:$0xff]  ;;  %v993_v19 = vld [vmem:[#allocation4 + $0xe0] sm:$0xff]  ;;  %v992_v38 = vld [vmem:[#allocation4 + $0xd8] sm:$0xff] }
  0x2e   : > { %682 = vmatpush.msra.mxu2 %v615_v58  ;;  %746 = vmatpush.msra.mxu3 %v649_v59  ;;  %v1027_v18 = vld [vmem:[#allocation4 + $0x1f0] sm:$0xff]  ;;  %v1025_v22 = vld [vmem:[#allocation4 + $0x1e0] sm:$0xff]  ;;  %v1024_v44 = vld [vmem:[#allocation4 + $0x1d8] sm:$0xff] }
  0x2f   : > { %816 = vmatpush.msrb.mxu0 %v608_v54  ;;  %881 = vmatpush.msrb.mxu1 %v640_v57  ;;  %v386_v24 = vld [vmem:[%s2520_s2] sm:$0x3]  ;;  %v989_v37 = vld [vmem:[#allocation4 + $0xc0] sm:$0xff]  ;;  %v990_v48 = vld [vmem:[#allocation4 + $0xc8] sm:$0xff] }
  0x30   : > { %1683 = vmatmul.msk.f32.gmra.mxu0 %vm392_vm0, %v371_v17  ;;  %1699 = vmatmul.msk.f32.gmra.mxu1 %vm392_vm0, %v371_v17  ;;  %v382_v17 = vld [vmem:[%s2016_s29 + $0x70] sm:$0xff]  ;;  %v2261_v25 = vperm.slane %v386_v24, 0  ;;  %v991_v27 = vld [vmem:[#allocation4 + $0xd0] sm:$0xff]  ;;  %v1022_v54 = vld [vmem:[#allocation4 + $0x1c8] sm:$0xff]  ;;  %s2483_s29 = scalar_lea.vmem %s2527_s9, %s1677_s26 }
  0x31   : > { %683 = vmatpush.msra.mxu2 %v613_v60  ;;  %747 = vmatpush.msra.mxu3 %v647_v61  ;;  %v1023_v33 = vld [vmem:[#allocation4 + $0x1d0] sm:$0xff]  ;;  %v1021_v43 = vld [vmem:[#allocation4 + $0x1c0] sm:$0xff]  ;;  %v988_v58 = vld [vmem:[#allocation4 + $0xb8] sm:$0xff] }
  0x32   : > { %817 = vmatpush.msrb.mxu0 %v606_v1  ;;  %882 = vmatpush.msrb.mxu1 %v638_v4  ;;  %v987_v47 = vld [vmem:[#allocation4 + $0xb0] sm:$0xff]  ;;  %v985_v57 = vld [vmem:[#allocation4 + $0xa0] sm:$0xff]  ;;  %v986_v4 = vld [vmem:[#allocation4 + $0xa8] sm:$0xff] }
  0x33   : > { %684 = vmatpush.msra.mxu2 %v611_v63  ;;  %748 = vmatpush.msra.mxu3 %v645_v0  ;;  %v1019_v53 = vld [vmem:[#allocation4 + $0x1b0] sm:$0xff]  ;;  %v1017_v63 = vld [vmem:[#allocation4 + $0x1a0] sm:$0xff]  ;;  %v1020_v0 = vld [vmem:[#allocation4 + $0x1b8] sm:$0xff] }
  0x34   : > { %818 = vmatpush.msrb.mxu0 %v604_v12  ;;  %883 = vmatpush.msrb.mxu1 %v636_v14  ;;  %v984_v14 = vld [vmem:[#allocation4 + $0x98] sm:$0xff] }
  0x35   : > { %685 = vmatpush.msra.mxu2 %v609_v2  ;;  %749 = vmatpush.msra.mxu3 %v643_v3  ;;  %v983_v3 = vld [vmem:[#allocation4 + $0x90] sm:$0xff] }
  0x37   : > { %686 = vmatpush.msra.mxu2 %v607_v5  ;;  %750 = vmatpush.msra.mxu3 %v641_v6 }
  0x38   : > { %1684 = vmatmul.msk.f32.gmra.mxu0 %vm392_vm0, %v372_v20  ;;  %1700 = vmatmul.msk.f32.gmra.mxu1 %vm392_vm0, %v372_v20  ;;  %v996_v20 = vld [vmem:[#allocation4 + $0xf8] sm:$0xff] }
  0x39   : > { %687 = vmatpush.msra.mxu2 %v605_v8  ;;  %751 = vmatpush.msra.mxu3 %v639_v9  ;;  %v1015_v9 = vld [vmem:[#allocation4 + $0x190] sm:$0xff] }
  0x3a   : > { %1165 = vmatpush.msra.mxu0 %v996_v20  ;;  %v1016_v20 = vld [vmem:[#allocation4 + $0x198] sm:$0xff] }
  0x3b   : > { %688 = vmatpush.msra.mxu2 %v603_v10  ;;  %752 = vmatpush.msra.mxu3 %v637_v11  ;;  %v1018_v10 = vld [vmem:[#allocation4 + $0x1a8] sm:$0xff] }
  0x3c   : > { %1166 = vmatpush.msra.mxu0 %v994_v28 }
  0x3d   : > { %753 = vmatpush.msra.mxu3 %v635_v13  ;;  %1035 = vmatpush.msrb.mxu2 %v995_v16  ;;  %v981_v13 = vld [vmem:[#allocation4 + $0x80] sm:$0xff] }
  0x3e   : > { %1167 = vmatpush.msra.mxu0 %v992_v38 }
  0x3f   : > { %1100 = vmatpush.msrb.mxu3 %v1027_v18  ;;  %1036 = vmatpush.msrb.mxu2 %v993_v19  ;;  %v1013_v19 = vld [vmem:[#allocation4 + $0x180] sm:$0xff] }
  0x40   : > { %1685 = vmatmul.msk.f32.gmra.mxu0 %vm392_vm0, %v373_v23  ;;  %1701 = vmatmul.msk.f32.gmra.mxu1 %vm392_vm0, %v373_v23  ;;  %v1028_v23 = vld [vmem:[#allocation4 + $0x1f8] sm:$0xff] }
  0x41   : > { %1101 = vmatpush.msrb.mxu3 %v1025_v22  ;;  %1230 = vmatpush.msra.mxu1 %v1028_v23  ;;  %v979_v23 = vld [vmem:[#allocation4 + $0x70] sm:$0xff] }
  0x42   : > { %1037 = vmatpush.msrb.mxu2 %v991_v27  ;;  %1168 = vmatpush.msra.mxu0 %v990_v48 }
  0x43   : > { %1102 = vmatpush.msrb.mxu3 %v1023_v33  ;;  %1231 = vmatpush.msra.mxu1 %v1026_v34 }
  0x44   : > { %1038 = vmatpush.msrb.mxu2 %v989_v37  ;;  %1169 = vmatpush.msra.mxu0 %v988_v58 }
  0x45   : > { %1103 = vmatpush.msrb.mxu3 %v1021_v43  ;;  %1232 = vmatpush.msra.mxu1 %v1024_v44 }
  0x46   : > { %1039 = vmatpush.msrb.mxu2 %v987_v47  ;;  %1170 = vmatpush.msra.mxu0 %v986_v4 }
  0x47   : > { %1104 = vmatpush.msrb.mxu3 %v1019_v53  ;;  %1233 = vmatpush.msra.mxu1 %v1022_v54 }
  0x48   : > { %1686 = vmatmul.msk.f32.gmra.mxu0 %vm392_vm0, %v374_v26  ;;  %1702 = vmatmul.msk.f32.gmra.mxu1 %vm392_vm0, %v374_v26  ;;  %v2263_v26 = vperm.slane %v386_v24, 1  ;;  %v982_v24 = vld [vmem:[#allocation4 + $0x88] sm:$0xff] }
  0x49   : > { %1040 = vmatpush.msrb.mxu2 %v985_v57  ;;  %1105 = vmatpush.msrb.mxu3 %v1017_v63 }
  0x4a   : > { %1234 = vmatpush.msra.mxu1 %v1020_v0  ;;  %1171 = vmatpush.msra.mxu0 %v984_v14 }
  0x4b   : > { %1041 = vmatpush.msrb.mxu2 %v983_v3  ;;  %1106 = vmatpush.msrb.mxu3 %v1015_v9 }
  0x4c   : > { %1235 = vmatpush.msra.mxu1 %v1018_v10  ;;  %1172 = vmatpush.msra.mxu0 %v982_v24  ;;  %v1002_v24 = vld [vmem:[#allocation4 + $0x128] sm:$0xff] }
  0x4d   : > { %1042 = vmatpush.msrb.mxu2 %v981_v13  ;;  %1107 = vmatpush.msrb.mxu3 %v1013_v19 }
  0x4e   : > { %1236 = vmatpush.msra.mxu1 %v1016_v20 }
  0x4f   : > { %1043 = vmatpush.msrb.mxu2 %v979_v23  ;;  %v999_v23 = vld [vmem:[#allocation4 + $0x110] sm:$0xff] }
  0x50   : > { %1687 = vmatmul.msk.f32.gmra.mxu0 %vm392_vm0, %v375_v29  ;;  %1703 = vmatmul.msk.f32.gmra.mxu1 %vm392_vm0, %v375_v29 }
  0x58   : > { %1688 = vmatmul.msk.f32.gmra.mxu0 %vm392_vm0, %v376_v32  ;;  %1704 = vmatmul.msk.f32.gmra.mxu1 %vm392_vm0, %v376_v32 }
  0x60   : > { %1689 = vmatmul.msk.f32.gmra.mxu0 %vm392_vm0, %v377_v40  ;;  %1705 = vmatmul.msk.f32.gmra.mxu1 %vm392_vm0, %v377_v40 }
  0x68   : > { %1690 = vmatmul.msk.f32.gmra.mxu0 %vm392_vm0, %v378_v51  ;;  %1706 = vmatmul.msk.f32.gmra.mxu1 %vm392_vm0, %v378_v51 }
  0x70   : > { %1691 = vmatmul.msk.f32.gmra.mxu0 %vm392_vm0, %v379_v62  ;;  %1707 = vmatmul.msk.f32.gmra.mxu1 %vm392_vm0, %v379_v62 }
  0x78   : > { %1692 = vmatmul.msk.f32.gmra.mxu0 %vm392_vm0, %v380_v7  ;;  %1708 = vmatmul.msk.f32.gmra.mxu1 %vm392_vm0, %v380_v7 }
  0x80   : > { %1693 = vmatmul.msk.f32.gmra.mxu0 %vm392_vm0, %v381_v15  ;;  %1709 = vmatmul.msk.f32.gmra.mxu1 %vm392_vm0, %v381_v15 }
  0x88   : > { %1694 = vmatmul.msk.f32.gmra.mxu0 %vm392_vm0, %v382_v17  ;;  %1710 = vmatmul.msk.f32.gmra.mxu1 %vm392_vm0, %v382_v17 }
  0x90   : > { %1695 = vmatmul.msk.f32.gmra.mxu0 %vm392_vm0, %v383_v21  ;;  %1711 = vmatmul.msk.f32.gmra.mxu1 %vm392_vm0, %v383_v21 }
  0x95   : > { %v458_v29 = vpop.f32.mrf.mxu0  ;;  %v523_v30 = vpop.f32.mrf.mxu1 }
  0x96   : > { %v459_v31 = vadd.f32 %v458_v29, %v2261_v25  ;;  %v524_v32 = vadd.f32 %v523_v30, %v2263_v26 }
  0x98   : > { %v571_v35 = vmax.f32 %v459_v31, 0.0  ;;  %v572_v36 = vmax.f32 %v524_v32, 0.0  ;;  %v1011_v31 = vld [vmem:[#allocation4 + $0x170] sm:$0xff]  ;;  %v1014_v32 = vld [vmem:[#allocation4 + $0x188] sm:$0xff] }
  0x99   : > { %1108 = vmatpush.msrb.mxu3 %v1011_v31  ;;  %1237 = vmatpush.msra.mxu1 %v1014_v32 }
  0x9a   : > { %689 = vmatmul.f32.vlgmr.msra.gmra.mxu2 %v571_v35  ;;  %819 = vmatmul.f32.vlgmr.msrb.gmra.mxu0 %v571_v35  ;;  %v977_v35 = vld [vmem:[#allocation4 + $0x60] sm:$0xff] }
  0x9b   : > { %754 = vmatmul.f32.vlgmr.msra.gmra.mxu3 %v572_v36  ;;  %884 = vmatmul.f32.vlgmr.msrb.gmra.mxu1 %v572_v36  ;;  %v980_v36 = vld [vmem:[#allocation4 + $0x78] sm:$0xff] }
  0x9c   : > { %1044 = vmatpush.msrb.mxu2 %v977_v35  ;;  %1173 = vmatpush.msra.mxu0 %v980_v36  ;;  %v968_v35 = vld [vmem:[#allocation4 + $0x18] sm:$0xff]  ;;  %v997_v36 = vld [vmem:[#allocation4 + $0x100] sm:$0xff] }
  0x9d   : > { %v461_v39 = vpop.f32.mrf.mxu0  ;;  %v526_v40 = vpop.f32.mrf.mxu1 }
  0x9e   : > { %v462_v41 = vadd.f32 %v461_v39, %v2261_v25  ;;  %v527_v42 = vadd.f32 %v526_v40, %v2263_v26 }
  0xa0   : > { %v573_v45 = vmax.f32 %v462_v41, 0.0  ;;  %v574_v46 = vmax.f32 %v527_v42, 0.0  ;;  %v1009_v41 = vld [vmem:[#allocation4 + $0x160] sm:$0xff]  ;;  %v1012_v42 = vld [vmem:[#allocation4 + $0x178] sm:$0xff] }
  0xa1   : > { %1109 = vmatpush.msrb.mxu3 %v1009_v41  ;;  %1238 = vmatpush.msra.mxu1 %v1012_v42 }
  0xa2   : > { %692 = vmatmul.f32.gmra.mxu2 %v573_v45  ;;  %822 = vmatmul.f32.gmra.mxu0 %v573_v45  ;;  %v975_v45 = vld [vmem:[#allocation4 + $0x50] sm:$0xff] }
  0xa3   : > { %757 = vmatmul.f32.gmra.mxu3 %v574_v46  ;;  %887 = vmatmul.f32.gmra.mxu1 %v574_v46  ;;  %v978_v46 = vld [vmem:[#allocation4 + $0x68] sm:$0xff] }
  0xa4   : > { %1045 = vmatpush.msrb.mxu2 %v975_v45  ;;  %1174 = vmatpush.msra.mxu0 %v978_v46 }
  0xa5   : > { %v464_v49 = vpop.f32.mrf.mxu0  ;;  %v529_v50 = vpop.f32.mrf.mxu1 }
  0xa6   : > { %v465_v51 = vadd.f32 %v464_v49, %v2261_v25  ;;  %v530_v52 = vadd.f32 %v529_v50, %v2263_v26 }
  0xa8   : > { %v575_v55 = vmax.f32 %v465_v51, 0.0  ;;  %v576_v56 = vmax.f32 %v530_v52, 0.0  ;;  %v1007_v51 = vld [vmem:[#allocation4 + $0x150] sm:$0xff]  ;;  %v1010_v52 = vld [vmem:[#allocation4 + $0x168] sm:$0xff] }
  0xa9   : > { %1110 = vmatpush.msrb.mxu3 %v1007_v51  ;;  %1239 = vmatpush.msra.mxu1 %v1010_v52 }
  0xaa   : > { %695 = vmatmul.f32.gmra.mxu2 %v575_v55  ;;  %825 = vmatmul.f32.gmra.mxu0 %v575_v55  ;;  %v973_v55 = vld [vmem:[#allocation4 + $0x40] sm:$0xff] }
  0xab   : > { %760 = vmatmul.f32.gmra.mxu3 %v576_v56  ;;  %890 = vmatmul.f32.gmra.mxu1 %v576_v56  ;;  %v976_v56 = vld [vmem:[#allocation4 + $0x58] sm:$0xff] }
  0xac   : > { %1046 = vmatpush.msrb.mxu2 %v973_v55  ;;  %1175 = vmatpush.msra.mxu0 %v976_v56 }
  0xad   : > { %v467_v59 = vpop.f32.mrf.mxu0  ;;  %v532_v60 = vpop.f32.mrf.mxu1 }
  0xae   : > { %v468_v61 = vadd.f32 %v467_v59, %v2261_v25  ;;  %v533_v62 = vadd.f32 %v532_v60, %v2263_v26 }
  0xb0   : > { %v577_v1 = vmax.f32 %v468_v61, 0.0  ;;  %v578_v2 = vmax.f32 %v533_v62, 0.0  ;;  %v1005_v61 = vld [vmem:[#allocation4 + $0x140] sm:$0xff]  ;;  %v1008_v62 = vld [vmem:[#allocation4 + $0x158] sm:$0xff] }
  0xb1   : > { %1111 = vmatpush.msrb.mxu3 %v1005_v61  ;;  %1240 = vmatpush.msra.mxu1 %v1008_v62  ;;  %v1358_v61 = vld [vmem:[%s2525_s7 + $0xf8] sm:$0xff] }
  0xb2   : > { %698 = vmatmul.f32.gmra.mxu2 %v577_v1  ;;  %828 = vmatmul.f32.gmra.mxu0 %v577_v1  ;;  %v971_v1 = vld [vmem:[#allocation4 + $0x30] sm:$0xff] }
  0xb3   : > { %763 = vmatmul.f32.gmra.mxu3 %v578_v2  ;;  %893 = vmatmul.f32.gmra.mxu1 %v578_v2  ;;  %v974_v2 = vld [vmem:[#allocation4 + $0x48] sm:$0xff] }
  0xb4   : > { %1047 = vmatpush.msrb.mxu2 %v971_v1  ;;  %1176 = vmatpush.msra.mxu0 %v974_v2 }
  0xb5   : > { %v470_v5 = vpop.f32.mrf.mxu0  ;;  %v535_v6 = vpop.f32.mrf.mxu1 }
  0xb6   : > { %v471_v7 = vadd.f32 %v470_v5, %v2261_v25  ;;  %v536_v8 = vadd.f32 %v535_v6, %v2263_v26 }
  0xb8   : > { %v579_v11 = vmax.f32 %v471_v7, 0.0  ;;  %v580_v12 = vmax.f32 %v536_v8, 0.0  ;;  %v1003_v7 = vld [vmem:[#allocation4 + $0x130] sm:$0xff]  ;;  %v1006_v8 = vld [vmem:[#allocation4 + $0x148] sm:$0xff] }
  0xb9   : > { %1112 = vmatpush.msrb.mxu3 %v1003_v7  ;;  %1241 = vmatpush.msra.mxu1 %v1006_v8 }
  0xba   : > { %701 = vmatmul.f32.gmra.mxu2 %v579_v11  ;;  %831 = vmatmul.f32.gmra.mxu0 %v579_v11  ;;  %v969_v11 = vld [vmem:[#allocation4 + $0x20] sm:$0xff] }
  0xbb   : > { %766 = vmatmul.f32.gmra.mxu3 %v580_v12  ;;  %896 = vmatmul.f32.gmra.mxu1 %v580_v12  ;;  %v972_v12 = vld [vmem:[#allocation4 + $0x38] sm:$0xff] }
  0xbc   : > { %1048 = vmatpush.msrb.mxu2 %v969_v11  ;;  %1177 = vmatpush.msra.mxu0 %v972_v12 }
  0xbd   : > { %v473_v15 = vpop.f32.mrf.mxu0  ;;  %v538_v16 = vpop.f32.mrf.mxu1 }
  0xbe   : > { %v474_v17 = vadd.f32 %v473_v15, %v2261_v25  ;;  %v539_v18 = vadd.f32 %v538_v16, %v2263_v26 }
  0xc0   : > { %v581_v21 = vmax.f32 %v474_v17, 0.0  ;;  %v582_v22 = vmax.f32 %v539_v18, 0.0  ;;  %v1001_v17 = vld [vmem:[#allocation4 + $0x120] sm:$0xff]  ;;  %v1004_v18 = vld [vmem:[#allocation4 + $0x138] sm:$0xff] }
  0xc1   : > { %1113 = vmatpush.msrb.mxu3 %v1001_v17  ;;  %1242 = vmatpush.msra.mxu1 %v1004_v18 }
  0xc2   : > { %704 = vmatmul.f32.gmra.mxu2 %v581_v21  ;;  %834 = vmatmul.f32.gmra.mxu0 %v581_v21  ;;  %v967_v21 = vld [vmem:[#allocation4 + $0x10] sm:$0xff] }
  0xc3   : > { %769 = vmatmul.f32.gmra.mxu3 %v582_v22  ;;  %899 = vmatmul.f32.gmra.mxu1 %v582_v22  ;;  %v970_v22 = vld [vmem:[#allocation4 + $0x28] sm:$0xff] }
  0xc4   : > { %1049 = vmatpush.msrb.mxu2 %v967_v21  ;;  %1178 = vmatpush.msra.mxu0 %v970_v22  ;;  %v1356_v21 = vld [vmem:[%s2525_s7 + $0xe8] sm:$0xff] }
  0xc5   : > { %v476_v27 = vpop.f32.mrf.mxu0  ;;  %v541_v28 = vpop.f32.mrf.mxu1  ;;  %1114 = vmatpush.msrb.mxu3 %v999_v23  ;;  %1243 = vmatpush.msra.mxu1 %v1002_v24 }
  0xc6   : > { %v477_v29 = vadd.f32 %v476_v27, %v2261_v25  ;;  %v542_v30 = vadd.f32 %v541_v28, %v2263_v26  ;;  %1179 = vmatpush.msra.mxu0 %v968_v35  ;;  %v1355_v35 = vld [vmem:[%s2525_s7 + $0xe0] sm:$0xff] }
  0xc7   : > { %1115 = vmatpush.msrb.mxu3 %v997_v36 }
  0xc8   : > { %v583_v33 = vmax.f32 %v477_v29, 0.0  ;;  %v584_v34 = vmax.f32 %v542_v30, 0.0 }
  0xc9   : > { %1730 = vmatpush.msra.mxu3 %v1358_v61 }
  0xca   : > { %707 = vmatmul.f32.gmra.mxu2 %v583_v33  ;;  %837 = vmatmul.f32.gmra.mxu0 %v583_v33  ;;  %v1000_v33 = vld [vmem:[#allocation4 + $0x118] sm:$0xff] }
  0xcb   : > { %772 = vmatmul.f32.gmra.mxu3 %v584_v34  ;;  %902 = vmatmul.f32.gmra.mxu1 %v584_v34  ;;  %v965_v34 = vld [vmem:[#allocation4] sm:$0xff] }
  0xcc   : > { %1244 = vmatpush.msra.mxu1 %v1000_v33  ;;  %1050 = vmatpush.msrb.mxu2 %v965_v34 }
  0xcd   : > { %v479_v37 = vpop.f32.mrf.mxu0  ;;  %v544_v38 = vpop.f32.mrf.mxu1 }
  0xce   : > { %v480_v39 = vadd.f32 %v479_v37, %v2261_v25  ;;  %v545_v40 = vadd.f32 %v544_v38, %v2263_v26 }
  0xd0   : > { %v585_v43 = vmax.f32 %v480_v39, 0.0  ;;  %v586_v44 = vmax.f32 %v545_v40, 0.0  ;;  %v998_v39 = vld [vmem:[#allocation4 + $0x108] sm:$0xff] }
  0xd1   : > { %1245 = vmatpush.msra.mxu1 %v998_v39 }
  0xd2   : > { %710 = vmatmul.f32.gmra.mxu2 %v585_v43  ;;  %840 = vmatmul.f32.gmra.mxu0 %v585_v43 }
  0xd3   : > { %775 = vmatmul.f32.gmra.mxu3 %v586_v44  ;;  %905 = vmatmul.f32.gmra.mxu1 %v586_v44  ;;  %v966_v44 = vld [vmem:[#allocation4 + $0x8] sm:$0xff] }
  0xd4   : > { %1180 = vmatpush.msra.mxu0 %v966_v44  ;;  %1428 = vmatpush.msrb.mxu1 %v1358_v61 }
  0xd5   : > { %v482_v47 = vpop.f32.mrf.mxu0  ;;  %v547_v48 = vpop.f32.mrf.mxu1 }
  0xd6   : > { %v483_v49 = vadd.f32 %v482_v47, %v2261_v25  ;;  %v548_v50 = vadd.f32 %v547_v48, %v2263_v26 }
  0xd8   : > { %v587_v53 = vmax.f32 %v483_v49, 0.0  ;;  %v588_v54 = vmax.f32 %v548_v50, 0.0 }
  0xda   : > { %713 = vmatmul.f32.gmra.mxu2 %v587_v53  ;;  %843 = vmatmul.f32.gmra.mxu0 %v587_v53 }
  0xdb   : > { %778 = vmatmul.f32.gmra.mxu3 %v588_v54  ;;  %908 = vmatmul.f32.gmra.mxu1 %v588_v54 }
  0xdd   : > { %v485_v57 = vpop.f32.mrf.mxu0  ;;  %v550_v58 = vpop.f32.mrf.mxu1 }
  0xde   : > { %v486_v59 = vadd.f32 %v485_v57, %v2261_v25  ;;  %v551_v60 = vadd.f32 %v550_v58, %v2263_v26  ;;  %v667_v57 = vld [vmem:[%s2522_s4] sm:$0x3] }
  0xdf   : > { %v2300_v58 = vperm.slane %v667_v57, 1 }
  0xe0   : > { %v589_v63 = vmax.f32 %v486_v59, 0.0  ;;  %v590_v0 = vmax.f32 %v551_v60, 0.0  ;;  %v1342_v59 = vld [vmem:[%s2525_s7 + $0x78] sm:$0xff] }
  0xe1   : > { %1714 = vmatpush.msra.mxu2 %v1342_v59  ;;  %1363 = vmatpush.msrb.mxu0 %v1342_v59 }
  0xe2   : > { %716 = vmatmul.f32.gmra.mxu2 %v589_v63  ;;  %846 = vmatmul.f32.gmra.mxu0 %v589_v63  ;;  %v2309_v63 = vperm.slane %v667_v57, 0 }
  0xe3   : > { %781 = vmatmul.f32.gmra.mxu3 %v590_v0  ;;  %911 = vmatmul.f32.gmra.mxu1 %v590_v0 }
  0xe5   : > { %v488_v3 = vpop.f32.mrf.mxu0  ;;  %v553_v4 = vpop.f32.mrf.mxu1 }
  0xe6   : > { %v489_v5 = vadd.f32 %v488_v3, %v2261_v25  ;;  %v554_v6 = vadd.f32 %v553_v4, %v2263_v26  ;;  %v1341_v4 = vld [vmem:[%s2525_s7 + $0x70] sm:$0xff] }
  0xe7   : > { %1715 = vmatpush.msra.mxu2 %v1341_v4  ;;  %1364 = vmatpush.msrb.mxu0 %v1341_v4 }
  0xe8   : > { %v591_v9 = vmax.f32 %v489_v5, 0.0  ;;  %v592_v10 = vmax.f32 %v554_v6, 0.0 }
  0xea   : > { %719 = vmatmul.f32.gmra.mxu2 %v591_v9  ;;  %849 = vmatmul.f32.gmra.mxu0 %v591_v9  ;;  %v1357_v9 = vld [vmem:[%s2525_s7 + $0xf0] sm:$0xff] }
  0xeb   : > { %784 = vmatmul.f32.gmra.mxu3 %v592_v10  ;;  %914 = vmatmul.f32.gmra.mxu1 %v592_v10 }
  0xec   : > { %1731 = vmatpush.msra.mxu3 %v1357_v9  ;;  %1429 = vmatpush.msrb.mxu1 %v1357_v9  ;;  %v1352_v9 = vld [vmem:[%s2525_s7 + $0xc8] sm:$0xff] }
  0xed   : > { %v491_v13 = vpop.f32.mrf.mxu0  ;;  %v556_v14 = vpop.f32.mrf.mxu1 }
  0xee   : > { %v492_v15 = vadd.f32 %v491_v13, %v2261_v25  ;;  %v557_v16 = vadd.f32 %v556_v14, %v2263_v26  ;;  %1732 = vmatpush.msra.mxu3 %v1356_v21  ;;  %1430 = vmatpush.msrb.mxu1 %v1356_v21  ;;  %v1351_v21 = vld [vmem:[%s2525_s7 + $0xc0] sm:$0xff] }
  0xf0   : > { %v593_v19 = vmax.f32 %v492_v15, 0.0  ;;  %v594_v20 = vmax.f32 %v557_v16, 0.0  ;;  %v1340_v16 = vld [vmem:[%s2525_s7 + $0x68] sm:$0xff]  ;;  %1733 = vmatpush.msra.mxu3 %v1355_v35  ;;  %1431 = vmatpush.msrb.mxu1 %v1355_v35  ;;  %v1350_v35 = vld [vmem:[%s2525_s7 + $0xb8] sm:$0xff] }
  0xf1   : > { %1716 = vmatpush.msra.mxu2 %v1340_v16  ;;  %1365 = vmatpush.msrb.mxu0 %v1340_v16 }
  0xf2   : > { %722 = vmatmul.f32.gmra.mxu2 %v593_v19  ;;  %852 = vmatmul.f32.gmra.mxu0 %v593_v19 }
  0xf3   : > { %787 = vmatmul.f32.gmra.mxu3 %v594_v20  ;;  %917 = vmatmul.f32.gmra.mxu1 %v594_v20 }
  0xf5   : > { %v494_v27 = vpop.f32.mrf.mxu0  ;;  %v559_v28 = vpop.f32.mrf.mxu1 }
  0xf6   : > { %v495_v29 = vadd.f32 %v494_v27, %v2261_v25  ;;  %v560_v30 = vadd.f32 %v559_v28, %v2263_v26 }
  0xf8   : > { %v595_v31 = vmax.f32 %v495_v29, 0.0  ;;  %v596_v32 = vmax.f32 %v560_v30, 0.0  ;;  %v1339_v30 = vld [vmem:[%s2525_s7 + $0x60] sm:$0xff] }
  0xf9   : > { %1717 = vmatpush.msra.mxu2 %v1339_v30  ;;  %1366 = vmatpush.msrb.mxu0 %v1339_v30 }
  0xfa   : > { %725 = vmatmul.f32.gmra.mxu2 %v595_v31  ;;  %855 = vmatmul.f32.gmra.mxu0 %v595_v31 }
  0xfb   : > { %790 = vmatmul.f32.gmra.mxu3 %v596_v32  ;;  %920 = vmatmul.f32.gmra.mxu1 %v596_v32 }
  0xfd   : > { %v497_v37 = vpop.f32.mrf.mxu0  ;;  %v562_v38 = vpop.f32.mrf.mxu1 }
  0xfe   : > { %v498_v40 = vadd.f32 %v497_v37, %v2261_v25  ;;  %v563_v41 = vadd.f32 %v562_v38, %v2263_v26 }
 0x100   : > { %v597_v42 = vmax.f32 %v498_v40, 0.0  ;;  %v598_v43 = vmax.f32 %v563_v41, 0.0 }
 0x102   : > { %728 = vmatmul.f32.gmra.mxu2 %v597_v42  ;;  %858 = vmatmul.f32.gmra.mxu0 %v597_v42  ;;  %v1338_v42 = vld [vmem:[%s2525_s7 + $0x58] sm:$0xff] }
 0x103   : > { %793 = vmatmul.f32.gmra.mxu3 %v598_v43  ;;  %923 = vmatmul.f32.gmra.mxu1 %v598_v43 }
 0x104   : > { %1718 = vmatpush.msra.mxu2 %v1338_v42  ;;  %1367 = vmatpush.msrb.mxu0 %v1338_v42 }
 0x105   : > { %v500_v45 = vpop.f32.mrf.mxu0  ;;  %v565_v46 = vpop.f32.mrf.mxu1 }
 0x106   : > { %v501_v47 = vadd.f32 %v500_v45, %v2261_v25  ;;  %v566_v48 = vadd.f32 %v565_v46, %v2263_v26 }
 0x108   : > { %v599_v49 = vmax.f32 %v501_v47, 0.0  ;;  %v600_v50 = vmax.f32 %v566_v48, 0.0  ;;  %v1354_v47 = vld [vmem:[%s2525_s7 + $0xd8] sm:$0xff] }
 0x109   : > { %1734 = vmatpush.msra.mxu3 %v1354_v47  ;;  %1432 = vmatpush.msrb.mxu1 %v1354_v47  ;;  %v1349_v47 = vld [vmem:[%s2525_s7 + $0xb0] sm:$0xff] }
 0x10a   : > { %731 = vmatmul.f32.gmra.mxu2 %v599_v49  ;;  %861 = vmatmul.f32.gmra.mxu0 %v599_v49 }
 0x10b   : > { %796 = vmatmul.f32.gmra.mxu3 %v600_v50  ;;  %926 = vmatmul.f32.gmra.mxu1 %v600_v50 }
 0x10d   : > { %v503_v51 = vpop.f32.mrf.mxu0  ;;  %v568_v52 = vpop.f32.mrf.mxu1 }
 0x10e   : > { %v504_v53 = vadd.f32 %v503_v51, %v2261_v25  ;;  %v569_v54 = vadd.f32 %v568_v52, %v2263_v26 }
 0x110   : > { %v601_v55 = vmax.f32 %v504_v53, 0.0  ;;  %v602_v56 = vmax.f32 %v569_v54, 0.0  ;;  %v1337_v54 = vld [vmem:[%s2525_s7 + $0x50] sm:$0xff] }
 0x111   : > { %1719 = vmatpush.msra.mxu2 %v1337_v54  ;;  %1368 = vmatpush.msrb.mxu0 %v1337_v54 }
 0x112   : > { %734 = vmatmul.f32.gmra.mxu2 %v601_v55  ;;  %864 = vmatmul.f32.gmra.mxu0 %v601_v55 }
 0x113   : > { %799 = vmatmul.f32.gmra.mxu3 %v602_v56  ;;  %929 = vmatmul.f32.gmra.mxu1 %v602_v56 }
 0x117   : > { %v820_v60 = vpop.f32.mrf.mxu0 }
 0x118   : > { %v821_v25 = vadd.f32 %v820_v60, %v2300_v58  ;;  %v885_v26 = vpop.f32.mrf.mxu1 }
 0x11a   : > { %v886_v62 = vadd.f32 %v885_v26, %v821_v25  ;;  %v1353_v26 = vld [vmem:[%s2525_s7 + $0xd0] sm:$0xff] }
 0x11b   : > { %1735 = vmatpush.msra.mxu3 %v1353_v26  ;;  %1433 = vmatpush.msrb.mxu1 %v1353_v26 }
 0x11c   : > { %v934_v0 = vmax.f32 %v886_v62, 0.0 }
 0x11d   : > { %v690_v1 = vpop.f32.mrf.mxu2  ;;  %1736 = vmatpush.msra.mxu3 %v1352_v9  ;;  %1434 = vmatpush.msrb.mxu1 %v1352_v9 }
 0x11e   : > { %v691_v2 = vadd.f32 %v690_v1, %v2309_v63  ;;  %1116 = vmatmul.f32.vlgmr.msrb.gmra.mxu3 %v934_v0  ;;  %1246 = vmatmul.f32.vlgmr.msra.gmra.mxu1 %v934_v0  ;;  %v755_v3 = vpop.f32.mrf.mxu3 }
 0x11f   : > { %v823_v5 = vpop.f32.mrf.mxu0  ;;  %1737 = vmatpush.msra.mxu3 %v1351_v21  ;;  %1435 = vmatpush.msrb.mxu1 %v1351_v21  ;;  %v1329_v21 = vld [vmem:[%s2525_s7 + $0x10] sm:$0xff] }
 0x120   : > { %v756_v6 = vadd.f32 %v755_v3, %v691_v2  ;;  %v824_v7 = vadd.f32 %v823_v5, %v2300_v58  ;;  %v888_v8 = vpop.f32.mrf.mxu1  ;;  %v1336_v2 = vld [vmem:[%s2525_s7 + $0x48] sm:$0xff] }
 0x121   : > { %1720 = vmatpush.msra.mxu2 %v1336_v2  ;;  %1369 = vmatpush.msrb.mxu0 %v1336_v2 }
 0x122   : > { %v933_v10 = vmax.f32 %v756_v6, 0.0  ;;  %v889_v11 = vadd.f32 %v888_v8, %v824_v7  ;;  %1738 = vmatpush.msra.mxu3 %v1350_v35  ;;  %1436 = vmatpush.msrb.mxu1 %v1350_v35  ;;  %v1344_v35 = vld [vmem:[%s2525_s7 + $0x88] sm:$0xff] }
 0x124   : > { %1051 = vmatmul.f32.vlgmr.msrb.gmra.mxu2 %v933_v10  ;;  %1181 = vmatmul.f32.vlgmr.msra.gmra.mxu0 %v933_v10  ;;  %v936_v12 = vmax.f32 %v889_v11, 0.0 }
 0x125   : > { %v693_v13 = vpop.f32.mrf.mxu2  ;;  %1739 = vmatpush.msra.mxu3 %v1349_v47  ;;  %1437 = vmatpush.msrb.mxu1 %v1349_v47 }
 0x126   : > { %v694_v14 = vadd.f32 %v693_v13, %v2309_v63  ;;  %1119 = vmatmul.f32.gmra.mxu3 %v936_v12  ;;  %1249 = vmatmul.f32.gmra.mxu1 %v936_v12  ;;  %v758_v15 = vpop.f32.mrf.mxu3 }
 0x127   : > { %v826_v17 = vpop.f32.mrf.mxu0 }
 0x128   : > { %v759_v18 = vadd.f32 %v758_v15, %v694_v14  ;;  %v827_v19 = vadd.f32 %v826_v17, %v2300_v58  ;;  %v891_v20 = vpop.f32.mrf.mxu1  ;;  %v1335_v14 = vld [vmem:[%s2525_s7 + $0x40] sm:$0xff] }
 0x129   : > { %1721 = vmatpush.msra.mxu2 %v1335_v14  ;;  %1370 = vmatpush.msrb.mxu0 %v1335_v14 }
 0x12a   : > { %v892_v22 = vadd.f32 %v891_v20, %v827_v19  ;;  %v935_v23 = vmax.f32 %v759_v18, 0.0 }
 0x12c   : > { %1054 = vmatmul.f32.gmra.mxu2 %v935_v23  ;;  %1184 = vmatmul.f32.gmra.mxu0 %v935_v23  ;;  %v938_v24 = vmax.f32 %v892_v22, 0.0 }
 0x12d   : > { %v696_v27 = vpop.f32.mrf.mxu2 }
 0x12e   : > { %v697_v28 = vadd.f32 %v696_v27, %v2309_v63  ;;  %1122 = vmatmul.f32.gmra.mxu3 %v938_v24  ;;  %1252 = vmatmul.f32.gmra.mxu1 %v938_v24  ;;  %v761_v29 = vpop.f32.mrf.mxu3 }
 0x12f   : > { %v829_v31 = vpop.f32.mrf.mxu0 }
 0x130   : > { %v762_v32 = vadd.f32 %v761_v29, %v697_v28  ;;  %v830_v33 = vadd.f32 %v829_v31, %v2300_v58  ;;  %v894_v34 = vpop.f32.mrf.mxu1  ;;  %v1334_v28 = vld [vmem:[%s2525_s7 + $0x38] sm:$0xff] }
 0x131   : > { %1722 = vmatpush.msra.mxu2 %v1334_v28  ;;  %1371 = vmatpush.msrb.mxu0 %v1334_v28 }
 0x132   : > { %v895_v36 = vadd.f32 %v894_v34, %v830_v33  ;;  %v937_v37 = vmax.f32 %v762_v32, 0.0 }
 0x134   : > { %1057 = vmatmul.f32.gmra.mxu2 %v937_v37  ;;  %1187 = vmatmul.f32.gmra.mxu0 %v937_v37  ;;  %v940_v38 = vmax.f32 %v895_v36, 0.0 }
 0x135   : > { %v699_v39 = vpop.f32.mrf.mxu2 }
 0x136   : > { %v700_v40 = vadd.f32 %v699_v39, %v2309_v63  ;;  %1125 = vmatmul.f32.gmra.mxu3 %v940_v38  ;;  %1255 = vmatmul.f32.gmra.mxu1 %v940_v38  ;;  %v764_v41 = vpop.f32.mrf.mxu3 }
 0x137   : > { %v832_v43 = vpop.f32.mrf.mxu0 }
 0x138   : > { %v765_v44 = vadd.f32 %v764_v41, %v700_v40  ;;  %v833_v45 = vadd.f32 %v832_v43, %v2300_v58  ;;  %v897_v46 = vpop.f32.mrf.mxu1  ;;  %v1333_v40 = vld [vmem:[%s2525_s7 + $0x30] sm:$0xff] }
 0x139   : > { %1723 = vmatpush.msra.mxu2 %v1333_v40  ;;  %1372 = vmatpush.msrb.mxu0 %v1333_v40  ;;  %v1343_v40 = vld [vmem:[%s2525_s7 + $0x80] sm:$0xff] }
 0x13a   : > { %v898_v48 = vadd.f32 %v897_v46, %v833_v45  ;;  %v939_v49 = vmax.f32 %v765_v44, 0.0 }
 0x13c   : > { %1060 = vmatmul.f32.gmra.mxu2 %v939_v49  ;;  %1190 = vmatmul.f32.gmra.mxu0 %v939_v49  ;;  %v942_v50 = vmax.f32 %v898_v48, 0.0 }
 0x13d   : > { %v702_v51 = vpop.f32.mrf.mxu2 }
 0x13e   : > { %v703_v52 = vadd.f32 %v702_v51, %v2309_v63  ;;  %1128 = vmatmul.f32.gmra.mxu3 %v942_v50  ;;  %1258 = vmatmul.f32.gmra.mxu1 %v942_v50  ;;  %v767_v53 = vpop.f32.mrf.mxu3 }
 0x13f   : > { %v835_v55 = vpop.f32.mrf.mxu0 }
 0x140   : > { %v768_v56 = vadd.f32 %v767_v53, %v703_v52  ;;  %v836_v57 = vadd.f32 %v835_v55, %v2300_v58  ;;  %v900_v59 = vpop.f32.mrf.mxu1  ;;  %v1332_v52 = vld [vmem:[%s2525_s7 + $0x28] sm:$0xff] }
 0x141   : > { %1724 = vmatpush.msra.mxu2 %v1332_v52  ;;  %1373 = vmatpush.msrb.mxu0 %v1332_v52 }
 0x142   : > { %v901_v60 = vadd.f32 %v900_v59, %v836_v57  ;;  %v941_v25 = vmax.f32 %v768_v56, 0.0 }
 0x144   : > { %1063 = vmatmul.f32.gmra.mxu2 %v941_v25  ;;  %1193 = vmatmul.f32.gmra.mxu0 %v941_v25  ;;  %v944_v61 = vmax.f32 %v901_v60, 0.0  ;;  %v1348_v60 = vld [vmem:[%s2525_s7 + $0xa8] sm:$0xff] }
 0x145   : > { %v705_v62 = vpop.f32.mrf.mxu2  ;;  %1740 = vmatpush.msra.mxu3 %v1348_v60  ;;  %1438 = vmatpush.msrb.mxu1 %v1348_v60 }
 0x146   : > { %v706_v0 = vadd.f32 %v705_v62, %v2309_v63  ;;  %1131 = vmatmul.f32.gmra.mxu3 %v944_v61  ;;  %1261 = vmatmul.f32.gmra.mxu1 %v944_v61  ;;  %v770_v1 = vpop.f32.mrf.mxu3 }
 0x147   : > { %v838_v3 = vpop.f32.mrf.mxu0 }
 0x148   : > { %v771_v4 = vadd.f32 %v770_v1, %v706_v0  ;;  %v839_v5 = vadd.f32 %v838_v3, %v2300_v58  ;;  %v903_v6 = vpop.f32.mrf.mxu1  ;;  %v1331_v0 = vld [vmem:[%s2525_s7 + $0x20] sm:$0xff] }
 0x149   : > { %1725 = vmatpush.msra.mxu2 %v1331_v0  ;;  %1374 = vmatpush.msrb.mxu0 %v1331_v0 }
 0x14a   : > { %v904_v7 = vadd.f32 %v903_v6, %v839_v5  ;;  %v943_v8 = vmax.f32 %v771_v4, 0.0 }
 0x14c   : > { %1066 = vmatmul.f32.gmra.mxu2 %v943_v8  ;;  %1196 = vmatmul.f32.gmra.mxu0 %v943_v8  ;;  %v946_v10 = vmax.f32 %v904_v7, 0.0  ;;  %v1347_v7 = vld [vmem:[%s2525_s7 + $0xa0] sm:$0xff] }
 0x14d   : > { %v708_v11 = vpop.f32.mrf.mxu2  ;;  %1741 = vmatpush.msra.mxu3 %v1347_v7  ;;  %1439 = vmatpush.msrb.mxu1 %v1347_v7 }
 0x14e   : > { %v709_v12 = vadd.f32 %v708_v11, %v2309_v63  ;;  %1134 = vmatmul.f32.gmra.mxu3 %v946_v10  ;;  %1264 = vmatmul.f32.gmra.mxu1 %v946_v10  ;;  %v773_v13 = vpop.f32.mrf.mxu3 }
 0x14f   : > { %v841_v15 = vpop.f32.mrf.mxu0 }
 0x150   : > { %v774_v16 = vadd.f32 %v773_v13, %v709_v12  ;;  %v842_v17 = vadd.f32 %v841_v15, %v2300_v58  ;;  %v906_v18 = vpop.f32.mrf.mxu1  ;;  %v1330_v12 = vld [vmem:[%s2525_s7 + $0x18] sm:$0xff] }
 0x151   : > { %1726 = vmatpush.msra.mxu2 %v1330_v12  ;;  %1375 = vmatpush.msrb.mxu0 %v1330_v12 }
 0x152   : > { %v907_v19 = vadd.f32 %v906_v18, %v842_v17  ;;  %v945_v20 = vmax.f32 %v774_v16, 0.0 }
 0x153   : > { %1727 = vmatpush.msra.mxu2 %v1329_v21  ;;  %1376 = vmatpush.msrb.mxu0 %v1329_v21 }
 0x154   : > { %1069 = vmatmul.f32.gmra.mxu2 %v945_v20  ;;  %1199 = vmatmul.f32.gmra.mxu0 %v945_v20  ;;  %v948_v22 = vmax.f32 %v907_v19, 0.0  ;;  %v1346_v19 = vld [vmem:[%s2525_s7 + $0x98] sm:$0xff] }
 0x155   : > { %v711_v23 = vpop.f32.mrf.mxu2  ;;  %1742 = vmatpush.msra.mxu3 %v1346_v19  ;;  %1440 = vmatpush.msrb.mxu1 %v1346_v19 }
 0x156   : > { %v712_v24 = vadd.f32 %v711_v23, %v2309_v63  ;;  %1137 = vmatmul.f32.gmra.mxu3 %v948_v22  ;;  %1267 = vmatmul.f32.gmra.mxu1 %v948_v22  ;;  %v776_v27 = vpop.f32.mrf.mxu3  ;;  %v1345_v22 = vld [vmem:[%s2525_s7 + $0x90] sm:$0xff] }
 0x157   : > { %v844_v29 = vpop.f32.mrf.mxu0  ;;  %1743 = vmatpush.msra.mxu3 %v1345_v22  ;;  %1441 = vmatpush.msrb.mxu1 %v1345_v22 }
 0x158   : > { %v777_v30 = vadd.f32 %v776_v27, %v712_v24  ;;  %v845_v31 = vadd.f32 %v844_v29, %v2300_v58  ;;  %v909_v32 = vpop.f32.mrf.mxu1 }
 0x159   : > { %1442 = vmatpush.msrb.mxu1 %v1344_v35  ;;  %1744 = vmatpush.msra.mxu3 %v1344_v35 }
 0x15a   : > { %v910_v33 = vadd.f32 %v909_v32, %v845_v31  ;;  %v947_v34 = vmax.f32 %v777_v30, 0.0 }
 0x15b   : > { %1443 = vmatpush.msrb.mxu1 %v1343_v40  ;;  %1745 = vmatpush.msra.mxu3 %v1343_v40 }
 0x15c   : > { %v950_v36 = vmax.f32 %v910_v33, 0.0  ;;  %1072 = vmatmul.f32.gmra.mxu2 %v947_v34  ;;  %1202 = vmatmul.f32.gmra.mxu0 %v947_v34 }
 0x15d   : > { %v714_v37 = vpop.f32.mrf.mxu2 }
 0x15e   : > { %v715_v38 = vadd.f32 %v714_v37, %v2309_v63  ;;  %1140 = vmatmul.f32.gmra.mxu3 %v950_v36  ;;  %1270 = vmatmul.f32.gmra.mxu1 %v950_v36  ;;  %v779_v39 = vpop.f32.mrf.mxu3 }
 0x15f   : > { %v847_v41 = vpop.f32.mrf.mxu0 }
 0x160   : > { %v780_v42 = vadd.f32 %v779_v39, %v715_v38  ;;  %v848_v43 = vadd.f32 %v847_v41, %v2300_v58  ;;  %v912_v44 = vpop.f32.mrf.mxu1  ;;  %v1328_v39 = vld [vmem:[%s2525_s7 + $0x8] sm:$0xff] }
 0x161   : > { %1728 = vmatpush.msra.mxu2 %v1328_v39  ;;  %1377 = vmatpush.msrb.mxu0 %v1328_v39 }
 0x162   : > { %v949_v45 = vmax.f32 %v780_v42, 0.0  ;;  %v913_v46 = vadd.f32 %v912_v44, %v848_v43 }
 0x164   : > { %v952_v48 = vmax.f32 %v913_v46, 0.0  ;;  %1075 = vmatmul.f32.gmra.mxu2 %v949_v45  ;;  %1205 = vmatmul.f32.gmra.mxu0 %v949_v45 }
 0x165   : > { %v717_v49 = vpop.f32.mrf.mxu2 }
 0x166   : > { %v718_v50 = vadd.f32 %v717_v49, %v2309_v63  ;;  %1143 = vmatmul.f32.gmra.mxu3 %v952_v48  ;;  %1273 = vmatmul.f32.gmra.mxu1 %v952_v48  ;;  %v782_v51 = vpop.f32.mrf.mxu3  ;;  %v1327_v48 = vld [vmem:[%s2525_s7] sm:$0xff] }
 0x167   : > { %v850_v53 = vpop.f32.mrf.mxu0  ;;  %1378 = vmatpush.msrb.mxu0 %v1327_v48  ;;  %1729 = vmatpush.msra.mxu2 %v1327_v48 }
 0x168   : > { %v783_v54 = vadd.f32 %v782_v51, %v718_v50  ;;  %v851_v55 = vadd.f32 %v850_v53, %v2300_v58  ;;  %v915_v56 = vpop.f32.mrf.mxu1 }
 0x16a   : > { %v951_v57 = vmax.f32 %v783_v54, 0.0  ;;  %v916_v59 = vadd.f32 %v915_v56, %v851_v55 }
 0x16c   : > { %v954_v25 = vmax.f32 %v916_v59, 0.0  ;;  %1078 = vmatmul.f32.gmra.mxu2 %v951_v57  ;;  %1208 = vmatmul.f32.gmra.mxu0 %v951_v57 }
 0x16d   : > { %v720_v26 = vpop.f32.mrf.mxu2 }
 0x16e   : > { %v721_v61 = vadd.f32 %v720_v26, %v2309_v63  ;;  %1146 = vmatmul.f32.gmra.mxu3 %v954_v25  ;;  %1276 = vmatmul.f32.gmra.mxu1 %v954_v25  ;;  %v785_v62 = vpop.f32.mrf.mxu3 }
 0x16f   : > { %v853_v1 = vpop.f32.mrf.mxu0 }
 0x170   : > { %v786_v2 = vadd.f32 %v785_v62, %v721_v61  ;;  %v854_v3 = vadd.f32 %v853_v1, %v2300_v58  ;;  %v918_v4 = vpop.f32.mrf.mxu1  ;;  %v1029_v1 = vld [vmem:[%s2524_s6] sm:$0x3] }
 0x172   : > { %v953_v5 = vmax.f32 %v786_v2, 0.0  ;;  %v919_v6 = vadd.f32 %v918_v4, %v854_v3 }
 0x174   : > { %v956_v8 = vmax.f32 %v919_v6, 0.0  ;;  %1081 = vmatmul.f32.gmra.mxu2 %v953_v5  ;;  %1211 = vmatmul.f32.gmra.mxu0 %v953_v5  ;;  %v2438_v6 = vperm.slane %v1029_v1, 0 }
 0x175   : > { %v723_v9 = vpop.f32.mrf.mxu2 }
 0x176   : > { %v724_v10 = vadd.f32 %v723_v9, %v2309_v63  ;;  %1149 = vmatmul.f32.gmra.mxu3 %v956_v8  ;;  %1279 = vmatmul.f32.gmra.mxu1 %v956_v8  ;;  %v788_v11 = vpop.f32.mrf.mxu3 }
 0x177   : > { %v856_v13 = vpop.f32.mrf.mxu0 }
 0x178   : > { %v789_v14 = vadd.f32 %v788_v11, %v724_v10  ;;  %v857_v15 = vadd.f32 %v856_v13, %v2300_v58  ;;  %v921_v16 = vpop.f32.mrf.mxu1 }
 0x17a   : > { %v955_v17 = vmax.f32 %v789_v14, 0.0  ;;  %v922_v18 = vadd.f32 %v921_v16, %v857_v15 }
 0x17c   : > { %v958_v20 = vmax.f32 %v922_v18, 0.0  ;;  %1084 = vmatmul.f32.gmra.mxu2 %v955_v17  ;;  %1214 = vmatmul.f32.gmra.mxu0 %v955_v17 }
 0x17d   : > { %v726_v23 = vpop.f32.mrf.mxu2 }
 0x17e   : > { %v727_v24 = vadd.f32 %v726_v23, %v2309_v63  ;;  %1152 = vmatmul.f32.gmra.mxu3 %v958_v20  ;;  %1282 = vmatmul.f32.gmra.mxu1 %v958_v20  ;;  %v791_v27 = vpop.f32.mrf.mxu3 }
 0x17f   : > { %v859_v28 = vpop.f32.mrf.mxu0 }
 0x180   : > { %v792_v29 = vadd.f32 %v791_v27, %v727_v24  ;;  %v860_v30 = vadd.f32 %v859_v28, %v2300_v58  ;;  %v924_v31 = vpop.f32.mrf.mxu1 }
 0x182   : > { %v957_v32 = vmax.f32 %v792_v29, 0.0  ;;  %v925_v33 = vadd.f32 %v924_v31, %v860_v30 }
 0x184   : > { %v960_v34 = vmax.f32 %v925_v33, 0.0  ;;  %1087 = vmatmul.f32.gmra.mxu2 %v957_v32  ;;  %1217 = vmatmul.f32.gmra.mxu0 %v957_v32 }
 0x185   : > { %v729_v36 = vpop.f32.mrf.mxu2 }
 0x186   : > { %v730_v37 = vadd.f32 %v729_v36, %v2309_v63  ;;  %1155 = vmatmul.f32.gmra.mxu3 %v960_v34  ;;  %1285 = vmatmul.f32.gmra.mxu1 %v960_v34  ;;  %v794_v38 = vpop.f32.mrf.mxu3 }
 0x187   : > { %v862_v41 = vpop.f32.mrf.mxu0 }
 0x188   : > { %v795_v42 = vadd.f32 %v794_v38, %v730_v37  ;;  %v863_v43 = vadd.f32 %v862_v41, %v2300_v58  ;;  %v927_v44 = vpop.f32.mrf.mxu1 }
 0x18a   : > { %v959_v45 = vmax.f32 %v795_v42, 0.0  ;;  %v928_v46 = vadd.f32 %v927_v44, %v863_v43 }
 0x18c   : > { %v962_v47 = vmax.f32 %v928_v46, 0.0  ;;  %1090 = vmatmul.f32.gmra.mxu2 %v959_v45  ;;  %1220 = vmatmul.f32.gmra.mxu0 %v959_v45 }
 0x18d   : > { %v732_v49 = vpop.f32.mrf.mxu2 }
 0x18e   : > { %v733_v50 = vadd.f32 %v732_v49, %v2309_v63  ;;  %1158 = vmatmul.f32.gmra.mxu3 %v962_v47  ;;  %1288 = vmatmul.f32.gmra.mxu1 %v962_v47  ;;  %v797_v51 = vpop.f32.mrf.mxu3 }
 0x18f   : > { %v865_v52 = vpop.f32.mrf.mxu0 }
 0x190   : > { %v798_v53 = vadd.f32 %v797_v51, %v733_v50  ;;  %v866_v54 = vadd.f32 %v865_v52, %v2300_v58  ;;  %v930_v55 = vpop.f32.mrf.mxu1  ;;  %v2435_v58 = vperm.slane %v1029_v1, 1 }
 0x192   : > { %v961_v56 = vmax.f32 %v798_v53, 0.0  ;;  %v931_v57 = vadd.f32 %v930_v55, %v866_v54 }
 0x194   : > { %v964_v59 = vmax.f32 %v931_v57, 0.0  ;;  %1093 = vmatmul.f32.gmra.mxu2 %v961_v56  ;;  %1223 = vmatmul.f32.gmra.mxu0 %v961_v56 }
 0x195   : > { %v735_v60 = vpop.f32.mrf.mxu2 }
 0x196   : > { %v736_v25 = vadd.f32 %v735_v60, %v2309_v63  ;;  %1161 = vmatmul.f32.gmra.mxu3 %v964_v59  ;;  %1291 = vmatmul.f32.gmra.mxu1 %v964_v59  ;;  %v800_v26 = vpop.f32.mrf.mxu3 }
 0x198   : > { %v801_v61 = vadd.f32 %v800_v26, %v736_v25 }
 0x19a   : > { %v963_v62 = vmax.f32 %v801_v61, 0.0 }
 0x19b   : > { %v1247_v0 = vpop.f32.mrf.mxu1 }
 0x19c   : > { %1096 = vmatmul.f32.gmra.mxu2 %v963_v62  ;;  %1226 = vmatmul.f32.gmra.mxu0 %v963_v62 }
 0x1a1   : > { %v1117_v2 = vpop.f32.mrf.mxu3  ;;  %v1182_v3 = vpop.f32.mrf.mxu0 }
 0x1a2   : > { %v1183_v4 = vadd.f32 %v1182_v3, %v2435_v58 }
 0x1a3   : > { %v1250_v5 = vpop.f32.mrf.mxu1 }
 0x1a4   : > { %v1248_v63 = vadd.f32 %v1247_v0, %v1183_v4 }
 0x1a6   : > { %v1296_v7 = vmax.f32 %v1248_v63, 0.0 }
 0x1a7   : > { %v1052_v8 = vpop.f32.mrf.mxu2 }
 0x1a8   : > { %v1053_v9 = vadd.f32 %v1052_v8, %v2438_v6  ;;  %1444 = vmatmul.f32.vlgmr.msrb.gmra.mxu1 %v1296_v7 }
 0x1a9   : > { %v1120_v10 = vpop.f32.mrf.mxu3  ;;  %v1185_v11 = vpop.f32.mrf.mxu0 }
 0x1aa   : > { %v1118_v12 = vadd.f32 %v1117_v2, %v1053_v9  ;;  %v1186_v13 = vadd.f32 %v1185_v11, %v2435_v58 }
 0x1ab   : > { %v1253_v14 = vpop.f32.mrf.mxu1 }
 0x1ac   : > { %v1295_v15 = vmax.f32 %v1118_v12, 0.0  ;;  %v1251_v16 = vadd.f32 %v1250_v5, %v1186_v13 }
 0x1ae   : > { %v1298_v17 = vmax.f32 %v1251_v16, 0.0  ;;  %1379 = vmatmul.f32.vlgmr.msrb.gmra.mxu0 %v1295_v15 }
 0x1af   : > { %v1055_v18 = vpop.f32.mrf.mxu2 }
 0x1b0   : > { %v1056_v19 = vadd.f32 %v1055_v18, %v2438_v6  ;;  %1447 = vmatmul.f32.vlgmr.msra.gmra.mxu3 %v1298_v17 }
 0x1b1   : > { %v1123_v20 = vpop.f32.mrf.mxu3  ;;  %v1188_v21 = vpop.f32.mrf.mxu0 }
 0x1b2   : > { %v1121_v22 = vadd.f32 %v1120_v10, %v1056_v19  ;;  %v1189_v23 = vadd.f32 %v1188_v21, %v2435_v58 }
 0x1b3   : > { %v1256_v24 = vpop.f32.mrf.mxu1 }
 0x1b4   : > { %v1297_v27 = vmax.f32 %v1121_v22, 0.0  ;;  %v1254_v28 = vadd.f32 %v1253_v14, %v1189_v23 }
 0x1b6   : > { %v1300_v29 = vmax.f32 %v1254_v28, 0.0  ;;  %1382 = vmatmul.f32.vlgmr.msra.gmra.mxu2 %v1297_v27 }
 0x1b7   : > { %v1058_v30 = vpop.f32.mrf.mxu2 }
 0x1b8   : > { %v1059_v31 = vadd.f32 %v1058_v30, %v2438_v6  ;;  %1450 = vmatmul.f32.gmra.mxu3 %v1300_v29 }
 0x1b9   : > { %v1126_v32 = vpop.f32.mrf.mxu3  ;;  %v1191_v33 = vpop.f32.mrf.mxu0 }
 0x1ba   : > { %v1124_v34 = vadd.f32 %v1123_v20, %v1059_v31  ;;  %v1192_v35 = vadd.f32 %v1191_v33, %v2435_v58 }
 0x1bb   : > { %v1259_v36 = vpop.f32.mrf.mxu1 }
 0x1bc   : > { %v1257_v37 = vadd.f32 %v1256_v24, %v1192_v35  ;;  %v1299_v38 = vmax.f32 %v1124_v34, 0.0 }
 0x1be   : > { %v1302_v39 = vmax.f32 %v1257_v37, 0.0  ;;  %1385 = vmatmul.f32.gmra.mxu2 %v1299_v38 }
 0x1bf   : > { %v1061_v40 = vpop.f32.mrf.mxu2 }
 0x1c0   : > { %v1062_v41 = vadd.f32 %v1061_v40, %v2438_v6  ;;  %1453 = vmatmul.f32.gmra.mxu3 %v1302_v39 }
 0x1c1   : > { %v1129_v42 = vpop.f32.mrf.mxu3  ;;  %v1194_v43 = vpop.f32.mrf.mxu0 }
 0x1c2   : > { %v1127_v44 = vadd.f32 %v1126_v32, %v1062_v41  ;;  %v1195_v45 = vadd.f32 %v1194_v43, %v2435_v58 }
 0x1c3   : > { %v1262_v46 = vpop.f32.mrf.mxu1 }
 0x1c4   : > { %v1260_v47 = vadd.f32 %v1259_v36, %v1195_v45  ;;  %v1301_v48 = vmax.f32 %v1127_v44, 0.0 }
 0x1c6   : > { %v1304_v49 = vmax.f32 %v1260_v47, 0.0  ;;  %1388 = vmatmul.f32.gmra.mxu2 %v1301_v48 }
 0x1c7   : > { %v1064_v50 = vpop.f32.mrf.mxu2 }
 0x1c8   : > { %v1065_v51 = vadd.f32 %v1064_v50, %v2438_v6  ;;  %1456 = vmatmul.f32.gmra.mxu3 %v1304_v49 }
 0x1c9   : > { %v1132_v52 = vpop.f32.mrf.mxu3  ;;  %v1197_v53 = vpop.f32.mrf.mxu0 }
 0x1ca   : > { %v1130_v54 = vadd.f32 %v1129_v42, %v1065_v51  ;;  %v1198_v55 = vadd.f32 %v1197_v53, %v2435_v58 }
 0x1cb   : > { %v1265_v56 = vpop.f32.mrf.mxu1 }
 0x1cc   : > { %v1263_v57 = vadd.f32 %v1262_v46, %v1198_v55  ;;  %v1303_v59 = vmax.f32 %v1130_v54, 0.0 }
 0x1ce   : > { %v1306_v60 = vmax.f32 %v1263_v57, 0.0  ;;  %1391 = vmatmul.f32.gmra.mxu2 %v1303_v59 }
 0x1cf   : > { %v1067_v25 = vpop.f32.mrf.mxu2 }
 0x1d0   : > { %v1068_v26 = vadd.f32 %v1067_v25, %v2438_v6  ;;  %1459 = vmatmul.f32.gmra.mxu3 %v1306_v60 }
 0x1d1   : > { %v1135_v61 = vpop.f32.mrf.mxu3  ;;  %v1200_v62 = vpop.f32.mrf.mxu0 }
 0x1d2   : > { %v1133_v0 = vadd.f32 %v1132_v52, %v1068_v26  ;;  %v1201_v1 = vadd.f32 %v1200_v62, %v2435_v58 }
 0x1d3   : > { %v1268_v2 = vpop.f32.mrf.mxu1 }
 0x1d4   : > { %v1266_v3 = vadd.f32 %v1265_v56, %v1201_v1  ;;  %v1305_v4 = vmax.f32 %v1133_v0, 0.0 }
 0x1d6   : > { %v1308_v5 = vmax.f32 %v1266_v3, 0.0  ;;  %1394 = vmatmul.f32.gmra.mxu2 %v1305_v4 }
 0x1d7   : > { %v1070_v63 = vpop.f32.mrf.mxu2 }
 0x1d8   : > { %v1071_v7 = vadd.f32 %v1070_v63, %v2438_v6  ;;  %1462 = vmatmul.f32.gmra.mxu3 %v1308_v5 }
 0x1d9   : > { %v1138_v8 = vpop.f32.mrf.mxu3  ;;  %v1203_v9 = vpop.f32.mrf.mxu0 }
 0x1da   : > { %v1136_v10 = vadd.f32 %v1135_v61, %v1071_v7  ;;  %v1204_v11 = vadd.f32 %v1203_v9, %v2435_v58 }
 0x1db   : > { %v1271_v12 = vpop.f32.mrf.mxu1 }
 0x1dc   : > { %v1269_v13 = vadd.f32 %v1268_v2, %v1204_v11  ;;  %v1307_v14 = vmax.f32 %v1136_v10, 0.0 }
 0x1de   : > { %v1310_v15 = vmax.f32 %v1269_v13, 0.0  ;;  %1397 = vmatmul.f32.gmra.mxu2 %v1307_v14 }
 0x1df   : > { %v1073_v16 = vpop.f32.mrf.mxu2 }
 0x1e0   : > { %v1074_v17 = vadd.f32 %v1073_v16, %v2438_v6  ;;  %1465 = vmatmul.f32.gmra.mxu3 %v1310_v15 }
 0x1e1   : > { %v1141_v18 = vpop.f32.mrf.mxu3  ;;  %v1206_v19 = vpop.f32.mrf.mxu0 }
 0x1e2   : > { %v1139_v20 = vadd.f32 %v1138_v8, %v1074_v17  ;;  %v1207_v21 = vadd.f32 %v1206_v19, %v2435_v58 }
 0x1e3   : > { %v1274_v22 = vpop.f32.mrf.mxu1 }
 0x1e4   : > { %v1309_v23 = vmax.f32 %v1139_v20, 0.0  ;;  %v1272_v24 = vadd.f32 %v1271_v12, %v1207_v21 }
 0x1e6   : > { %v1312_v27 = vmax.f32 %v1272_v24, 0.0  ;;  %1400 = vmatmul.f32.gmra.mxu2 %v1309_v23 }
 0x1e7   : > { %v1076_v28 = vpop.f32.mrf.mxu2 }
 0x1e8   : > { %v1077_v29 = vadd.f32 %v1076_v28, %v2438_v6  ;;  %1468 = vmatmul.f32.gmra.mxu3 %v1312_v27 }
 0x1e9   : > { %v1144_v30 = vpop.f32.mrf.mxu3  ;;  %v1209_v31 = vpop.f32.mrf.mxu0 }
 0x1ea   : > { %v1142_v32 = vadd.f32 %v1141_v18, %v1077_v29  ;;  %v1210_v33 = vadd.f32 %v1209_v31, %v2435_v58 }
 0x1eb   : > { %v1277_v34 = vpop.f32.mrf.mxu1 }
 0x1ec   : > { %v1311_v35 = vmax.f32 %v1142_v32, 0.0  ;;  %v1275_v36 = vadd.f32 %v1274_v22, %v1210_v33 }
 0x1ee   : > { %v1314_v37 = vmax.f32 %v1275_v36, 0.0  ;;  %1403 = vmatmul.f32.gmra.mxu2 %v1311_v35 }
 0x1ef   : > { %v1079_v38 = vpop.f32.mrf.mxu2 }
 0x1f0   : > { %v1080_v39 = vadd.f32 %v1079_v38, %v2438_v6  ;;  %1471 = vmatmul.f32.gmra.mxu3 %v1314_v37 }
 0x1f1   : > { %v1147_v40 = vpop.f32.mrf.mxu3  ;;  %v1212_v41 = vpop.f32.mrf.mxu0 }
 0x1f2   : > { %v1145_v42 = vadd.f32 %v1144_v30, %v1080_v39  ;;  %v1213_v43 = vadd.f32 %v1212_v41, %v2435_v58  ;;  %v2474_v39 = vld [vmem:[%s2526_s8] ss:$0 sm:$0xff] }
 0x1f3   : > { %v1280_v44 = vpop.f32.mrf.mxu1 }
 0x1f4   : > { %v1313_v45 = vmax.f32 %v1145_v42, 0.0  ;;  %v1278_v46 = vadd.f32 %v1277_v34, %v1213_v43 }
 0x1f6   : > { %v1316_v47 = vmax.f32 %v1278_v46, 0.0  ;;  %1406 = vmatmul.f32.gmra.mxu2 %v1313_v45 }
 0x1f7   : > { %v1082_v48 = vpop.f32.mrf.mxu2 }
 0x1f8   : > { %v1083_v49 = vadd.f32 %v1082_v48, %v2438_v6  ;;  %1474 = vmatmul.f32.gmra.mxu3 %v1316_v47 }
 0x1f9   : > { %v1150_v50 = vpop.f32.mrf.mxu3  ;;  %v1215_v51 = vpop.f32.mrf.mxu0 }
 0x1fa   : > { %v1148_v52 = vadd.f32 %v1147_v40, %v1083_v49  ;;  %v1216_v53 = vadd.f32 %v1215_v51, %v2435_v58 }
 0x1fb   : > { %v1283_v56 = vpop.f32.mrf.mxu1 }
 0x1fc   : > { %v1315_v54 = vmax.f32 %v1148_v52, 0.0  ;;  %v1281_v55 = vadd.f32 %v1280_v44, %v1216_v53 }
 0x1fe   : > { %v1318_v57 = vmax.f32 %v1281_v55, 0.0  ;;  %1409 = vmatmul.f32.gmra.mxu2 %v1315_v54 }
 0x1ff   : > { %v1085_v59 = vpop.f32.mrf.mxu2 }
 0x200   : > { %v1086_v60 = vadd.f32 %v1085_v59, %v2438_v6  ;;  %1477 = vmatmul.f32.gmra.mxu3 %v1318_v57 }
 0x201   : > { %v1218_v25 = vpop.f32.mrf.mxu0  ;;  %v1153_v62 = vpop.f32.mrf.mxu3 }
 0x202   : > { %v1151_v26 = vadd.f32 %v1150_v50, %v1086_v60  ;;  %v1219_v61 = vadd.f32 %v1218_v25, %v2435_v58 }
 0x203   : > { %v1286_v3 = vpop.f32.mrf.mxu1 }
 0x204   : > { %v1317_v0 = vmax.f32 %v1151_v26, 0.0  ;;  %v1284_v1 = vadd.f32 %v1283_v56, %v1219_v61 }
 0x206   : > { %v1320_v2 = vmax.f32 %v1284_v1, 0.0  ;;  %1412 = vmatmul.f32.gmra.mxu2 %v1317_v0 }
 0x207   : > { %v1088_v4 = vpop.f32.mrf.mxu2 }
 0x208   : > { %v1089_v5 = vadd.f32 %v1088_v4, %v2438_v6  ;;  %1480 = vmatmul.f32.gmra.mxu3 %v1320_v2 }
 0x209   : > { %v1221_v63 = vpop.f32.mrf.mxu0  ;;  %v1156_v11 = vpop.f32.mrf.mxu3 }
 0x20a   : > { %v1154_v7 = vadd.f32 %v1153_v62, %v1089_v5  ;;  %v1222_v8 = vadd.f32 %v1221_v63, %v2435_v58 }
 0x20b   : > { %v1289_v15 = vpop.f32.mrf.mxu1 }
 0x20c   : > { %v1319_v9 = vmax.f32 %v1154_v7, 0.0  ;;  %v1287_v10 = vadd.f32 %v1286_v3, %v1222_v8 }
 0x20e   : > { %v1322_v12 = vmax.f32 %v1287_v10, 0.0  ;;  %1415 = vmatmul.f32.gmra.mxu2 %v1319_v9 }
 0x20f   : > { %v1091_v13 = vpop.f32.mrf.mxu2 }
 0x210   : > { %v1092_v14 = vadd.f32 %v1091_v13, %v2438_v6  ;;  %1483 = vmatmul.f32.gmra.mxu3 %v1322_v12 }
 0x211   : > { %v1224_v16 = vpop.f32.mrf.mxu0  ;;  %v1159_v22 = vpop.f32.mrf.mxu3 }
 0x212   : > { %v1157_v17 = vadd.f32 %v1156_v11, %v1092_v14  ;;  %v1225_v18 = vadd.f32 %v1224_v16, %v2435_v58 }
 0x213   : > { %v1292_v30 = vpop.f32.mrf.mxu1 }
 0x214   : > { %v1321_v19 = vmax.f32 %v1157_v17, 0.0  ;;  %v1290_v20 = vadd.f32 %v1289_v15, %v1225_v18 }
 0x216   : > { %v1324_v21 = vmax.f32 %v1290_v20, 0.0  ;;  %1418 = vmatmul.f32.gmra.mxu2 %v1321_v19 }
 0x217   : > { %v1094_v23 = vpop.f32.mrf.mxu2 }
 0x218   : > { %v1095_v24 = vadd.f32 %v1094_v23, %v2438_v6  ;;  %1486 = vmatmul.f32.gmra.mxu3 %v1324_v21 }
 0x219   : > { %v1227_v27 = vpop.f32.mrf.mxu0  ;;  %v1162_v36 = vpop.f32.mrf.mxu3 }
 0x21a   : > { %v1160_v28 = vadd.f32 %v1159_v22, %v1095_v24  ;;  %v1228_v29 = vadd.f32 %v1227_v27, %v2435_v58 }
 0x21c   : > { %v1323_v31 = vmax.f32 %v1160_v28, 0.0  ;;  %v1293_v32 = vadd.f32 %v1292_v30, %v1228_v29 }
 0x21e   : > { %v1326_v33 = vmax.f32 %v1293_v32, 0.0  ;;  %1421 = vmatmul.f32.gmra.mxu2 %v1323_v31 }
 0x21f   : > { %v1097_v34 = vpop.f32.mrf.mxu2 }
 0x220   : > { %v1098_v35 = vadd.f32 %v1097_v34, %v2438_v6  ;;  %1489 = vmatmul.f32.gmra.mxu3 %v1326_v33 }
 0x222   : > { %v1163_v37 = vadd.f32 %v1162_v36, %v1098_v35 }
 0x224   : > { %v1325_v38 = vmax.f32 %v1163_v37, 0.0 }
 0x225   : > { %v1445_v41 = vpop.f32.mrf.mxu1 }
 0x226   : > { %1424 = vmatmul.f32.gmra.mxu2 %v1325_v38 }
 0x22b   : > { %v1380_v40 = vpop.f32.mrf.mxu0 }
 0x22c   : > { %v1381_v58 = vadd.f32 %v2474_v39, %v1380_v40 }
 0x22e   : > { %v1446_v42 = vadd.f32 %v1445_v41, %v1381_v58 }
 0x230   : > { %v1493_v43 = vsub.f32 0.0, %v1446_v42 }
 0x232   : > { %v1509_v44 = vmul.f32 1.442695, %v1493_v43 }
 0x233   : > { %v1448_v45 = vpop.f32.mrf.mxu3 }
 0x234   : > { %1778 = vpow2.f32 %v1509_v44 }
 0x239   : > { %v1383_v6 = vpop.f32.mrf.mxu2 }
 0x23a   : > { %v1779_v46 = vpop.eup %1778  ;;  %v1384_v47 = vadd.f32 %v2474_v39, %v1383_v6 }
 0x23b   : > { %v1541_v48 = vadd.f32 1.0, %v1779_v46  ;;  %v1451_v49 = vpop.f32.mrf.mxu3 }
 0x23c   : > { %v1449_v50 = vadd.f32 %v1448_v45, %v1384_v47 }
 0x23d   : > { %1780 = vrcp.f32 %v1541_v48 }
 0x23e   : > { %v1494_v51 = vsub.f32 0.0, %v1449_v50 }
 0x240   : > { %v1511_v52 = vmul.f32 1.442695, %v1494_v51 }
 0x241   : > { %v1386_v53 = vpop.f32.mrf.mxu2 }
 0x242   : > { %1782 = vpow2.f32 %v1511_v52  ;;  %v1387_v54 = vadd.f32 %v2474_v39, %v1386_v53 }
 0x243   : > { %v1781_v55 = vpop.eup %1780  ;;  %v1454_v56 = vpop.f32.mrf.mxu3 }
 0x244   : > { %1573 = vst [vmem:[%s2483_s29] sm:$0xff] %v1781_v55  ;;  %v1452_v57 = vadd.f32 %v1451_v49, %v1387_v54 }
 0x246   : > { %v1495_v59 = vsub.f32 0.0, %v1452_v57 }
 0x248   : > { %v1783_v60 = vpop.eup %1782  ;;  %v1513_v25 = vmul.f32 1.442695, %v1495_v59 }
 0x249   : > { %v1542_v26 = vadd.f32 1.0, %v1783_v60  ;;  %v1389_v61 = vpop.f32.mrf.mxu2 }
 0x24a   : > { %1784 = vpow2.f32 %v1513_v25  ;;  %v1390_v62 = vadd.f32 %v2474_v39, %v1389_v61 }
 0x24b   : > { %1786 = vrcp.f32 %v1542_v26  ;;  %v1457_v0 = vpop.f32.mrf.mxu3 }
 0x24c   : > { %v1455_v1 = vadd.f32 %v1454_v56, %v1390_v62 }
 0x24e   : > { %v1496_v2 = vsub.f32 0.0, %v1455_v1 }
 0x250   : > { %v1785_v3 = vpop.eup %1784  ;;  %v1515_v4 = vmul.f32 1.442695, %v1496_v2 }
 0x251   : > { %v1787_v5 = vpop.eup %1786  ;;  %v1543_v63 = vadd.f32 1.0, %v1785_v3  ;;  %v1392_v7 = vpop.f32.mrf.mxu2 }
 0x252   : > { %1574 = vst [vmem:[%s2483_s29 + $0x8] sm:$0xff] %v1787_v5  ;;  %1788 = vpow2.f32 %v1515_v4  ;;  %v1393_v8 = vadd.f32 %v2474_v39, %v1392_v7 }
 0x253   : > { %1790 = vrcp.f32 %v1543_v63  ;;  %v1460_v9 = vpop.f32.mrf.mxu3 }
 0x254   : > { %v1458_v10 = vadd.f32 %v1457_v0, %v1393_v8 }
 0x256   : > { %v1497_v11 = vsub.f32 0.0, %v1458_v10 }
 0x258   : > { %v1789_v12 = vpop.eup %1788  ;;  %v1517_v13 = vmul.f32 1.442695, %v1497_v11 }
 0x259   : > { %v1791_v14 = vpop.eup %1790  ;;  %v1544_v15 = vadd.f32 1.0, %v1789_v12  ;;  %v1395_v16 = vpop.f32.mrf.mxu2 }
 0x25a   : > { %1575 = vst [vmem:[%s2483_s29 + $0x10] sm:$0xff] %v1791_v14  ;;  %1792 = vpow2.f32 %v1517_v13  ;;  %v1396_v17 = vadd.f32 %v2474_v39, %v1395_v16 }
 0x25b   : > { %1794 = vrcp.f32 %v1544_v15  ;;  %v1463_v18 = vpop.f32.mrf.mxu3 }
 0x25c   : > { %v1461_v19 = vadd.f32 %v1460_v9, %v1396_v17 }
 0x25e   : > { %v1498_v20 = vsub.f32 0.0, %v1461_v19 }
 0x260   : > { %v1793_v21 = vpop.eup %1792  ;;  %v1519_v22 = vmul.f32 1.442695, %v1498_v20 }
 0x261   : > { %v1795_v23 = vpop.eup %1794  ;;  %v1545_v24 = vadd.f32 1.0, %v1793_v21  ;;  %v1398_v27 = vpop.f32.mrf.mxu2 }
 0x262   : > { %1576 = vst [vmem:[%s2483_s29 + $0x18] sm:$0xff] %v1795_v23  ;;  %1796 = vpow2.f32 %v1519_v22  ;;  %v1399_v28 = vadd.f32 %v2474_v39, %v1398_v27 }
 0x263   : > { %1798 = vrcp.f32 %v1545_v24  ;;  %v1466_v29 = vpop.f32.mrf.mxu3 }
 0x264   : > { %v1464_v30 = vadd.f32 %v1463_v18, %v1399_v28 }
 0x266   : > { %v1499_v31 = vsub.f32 0.0, %v1464_v30 }
 0x268   : > { %v1797_v32 = vpop.eup %1796  ;;  %v1521_v33 = vmul.f32 1.442695, %v1499_v31 }
 0x269   : > { %v1799_v34 = vpop.eup %1798  ;;  %v1546_v35 = vadd.f32 1.0, %v1797_v32  ;;  %v1401_v36 = vpop.f32.mrf.mxu2 }
 0x26a   : > { %1577 = vst [vmem:[%s2483_s29 + $0x20] sm:$0xff] %v1799_v34  ;;  %1800 = vpow2.f32 %v1521_v33  ;;  %v1402_v37 = vadd.f32 %v2474_v39, %v1401_v36 }
 0x26b   : > { %1802 = vrcp.f32 %v1546_v35  ;;  %v1469_v38 = vpop.f32.mrf.mxu3 }
 0x26c   : > { %v1467_v40 = vadd.f32 %v1466_v29, %v1402_v37 }
 0x26e   : > { %v1500_v58 = vsub.f32 0.0, %v1467_v40 }
 0x270   : > { %v1801_v41 = vpop.eup %1800  ;;  %v1523_v42 = vmul.f32 1.442695, %v1500_v58 }
 0x271   : > { %v1803_v43 = vpop.eup %1802  ;;  %v1547_v44 = vadd.f32 1.0, %v1801_v41  ;;  %v1404_v45 = vpop.f32.mrf.mxu2 }
 0x272   : > { %1578 = vst [vmem:[%s2483_s29 + $0x28] sm:$0xff] %v1803_v43  ;;  %1804 = vpow2.f32 %v1523_v42  ;;  %v1405_v6 = vadd.f32 %v2474_v39, %v1404_v45 }
 0x273   : > { %1806 = vrcp.f32 %v1547_v44  ;;  %v1472_v46 = vpop.f32.mrf.mxu3 }
 0x274   : > { %v1470_v47 = vadd.f32 %v1469_v38, %v1405_v6 }
 0x276   : > { %v1501_v48 = vsub.f32 0.0, %v1470_v47 }
 0x278   : > { %v1805_v49 = vpop.eup %1804  ;;  %v1525_v50 = vmul.f32 1.442695, %v1501_v48 }
 0x279   : > { %v1807_v51 = vpop.eup %1806  ;;  %v1548_v52 = vadd.f32 1.0, %v1805_v49  ;;  %v1407_v53 = vpop.f32.mrf.mxu2 }
 0x27a   : > { %1579 = vst [vmem:[%s2483_s29 + $0x30] sm:$0xff] %v1807_v51  ;;  %1808 = vpow2.f32 %v1525_v50  ;;  %v1408_v54 = vadd.f32 %v2474_v39, %v1407_v53 }
 0x27b   : > { %1810 = vrcp.f32 %v1548_v52  ;;  %v1475_v55 = vpop.f32.mrf.mxu3 }
 0x27c   : > { %v1473_v56 = vadd.f32 %v1472_v46, %v1408_v54 }
 0x27e   : > { %v1502_v57 = vsub.f32 0.0, %v1473_v56 }
 0x280   : > { %v1809_v59 = vpop.eup %1808  ;;  %v1527_v60 = vmul.f32 1.442695, %v1502_v57 }
 0x281   : > { %v1811_v25 = vpop.eup %1810  ;;  %v1549_v26 = vadd.f32 1.0, %v1809_v59  ;;  %v1410_v61 = vpop.f32.mrf.mxu2 }
 0x282   : > { %1580 = vst [vmem:[%s2483_s29 + $0x38] sm:$0xff] %v1811_v25  ;;  %1812 = vpow2.f32 %v1527_v60  ;;  %v1411_v62 = vadd.f32 %v2474_v39, %v1410_v61 }
 0x283   : > { %1814 = vrcp.f32 %v1549_v26  ;;  %v1478_v0 = vpop.f32.mrf.mxu3 }
 0x284   : > { %v1476_v1 = vadd.f32 %v1475_v55, %v1411_v62 }
 0x286   : > { %v1503_v2 = vsub.f32 0.0, %v1476_v1 }
 0x288   : > { %v1813_v3 = vpop.eup %1812  ;;  %v1529_v4 = vmul.f32 1.442695, %v1503_v2 }
 0x289   : > { %v1815_v5 = vpop.eup %1814  ;;  %v1550_v63 = vadd.f32 1.0, %v1813_v3  ;;  %v1413_v7 = vpop.f32.mrf.mxu2 }
 0x28a   : > { %1581 = vst [vmem:[%s2483_s29 + $0x40] sm:$0xff] %v1815_v5  ;;  %1816 = vpow2.f32 %v1529_v4  ;;  %v1414_v8 = vadd.f32 %v2474_v39, %v1413_v7 }
 0x28b   : > { %1818 = vrcp.f32 %v1550_v63  ;;  %v1481_v10 = vpop.f32.mrf.mxu3 }
 0x28c   : > { %v1479_v9 = vadd.f32 %v1478_v0, %v1414_v8 }
 0x28e   : > { %v1504_v11 = vsub.f32 0.0, %v1479_v9 }
 0x290   : > { %v1817_v12 = vpop.eup %1816  ;;  %v1531_v13 = vmul.f32 1.442695, %v1504_v11 }
 0x291   : > { %v1819_v14 = vpop.eup %1818  ;;  %v1551_v15 = vadd.f32 1.0, %v1817_v12  ;;  %v1416_v16 = vpop.f32.mrf.mxu2 }
 0x292   : > { %1582 = vst [vmem:[%s2483_s29 + $0x48] sm:$0xff] %v1819_v14  ;;  %1820 = vpow2.f32 %v1531_v13  ;;  %v1417_v17 = vadd.f32 %v2474_v39, %v1416_v16 }
 0x293   : > { %1822 = vrcp.f32 %v1551_v15  ;;  %v1484_v20 = vpop.f32.mrf.mxu3 }
 0x294   : > { %v1482_v18 = vadd.f32 %v1481_v10, %v1417_v17 }
 0x296   : > { %v1505_v19 = vsub.f32 0.0, %v1482_v18 }
 0x298   : > { %v1821_v21 = vpop.eup %1820  ;;  %v1533_v22 = vmul.f32 1.442695, %v1505_v19 }
 0x299   : > { %v1823_v23 = vpop.eup %1822  ;;  %v1552_v24 = vadd.f32 1.0, %v1821_v21  ;;  %v1419_v27 = vpop.f32.mrf.mxu2 }
 0x29a   : > { %1583 = vst [vmem:[%s2483_s29 + $0x50] sm:$0xff] %v1823_v23  ;;  %1824 = vpow2.f32 %v1533_v22  ;;  %v1420_v28 = vadd.f32 %v2474_v39, %v1419_v27 }
 0x29b   : > { %1826 = vrcp.f32 %v1552_v24  ;;  %v1487_v35 = vpop.f32.mrf.mxu3 }
 0x29c   : > { %v1485_v29 = vadd.f32 %v1484_v20, %v1420_v28 }
 0x29e   : > { %v1506_v30 = vsub.f32 0.0, %v1485_v29 }
 0x2a0   : > { %v1825_v31 = vpop.eup %1824  ;;  %v1535_v32 = vmul.f32 1.442695, %v1506_v30 }
 0x2a1   : > { %v1827_v33 = vpop.eup %1826  ;;  %v1553_v34 = vadd.f32 1.0, %v1825_v31  ;;  %v1422_v36 = vpop.f32.mrf.mxu2 }
 0x2a2   : > { %1584 = vst [vmem:[%s2483_s29 + $0x58] sm:$0xff] %v1827_v33  ;;  %1828 = vpow2.f32 %v1535_v32  ;;  %v1423_v37 = vadd.f32 %v2474_v39, %v1422_v36 }
 0x2a3   : > { %1830 = vrcp.f32 %v1553_v34  ;;  %v1490_v6 = vpop.f32.mrf.mxu3 }
 0x2a4   : > { %v1488_v38 = vadd.f32 %v1487_v35, %v1423_v37 }
 0x2a6   : > { %v1507_v40 = vsub.f32 0.0, %v1488_v38 }
 0x2a8   : > { %v1829_v58 = vpop.eup %1828  ;;  %v1537_v41 = vmul.f32 1.442695, %v1507_v40 }
 0x2a9   : > { %v1831_v42 = vpop.eup %1830  ;;  %v1554_v43 = vadd.f32 1.0, %v1829_v58  ;;  %v1425_v44 = vpop.f32.mrf.mxu2 }
 0x2aa   : > { %1585 = vst [vmem:[%s2483_s29 + $0x60] sm:$0xff] %v1831_v42  ;;  %1832 = vpow2.f32 %v1537_v41  ;;  %v1426_v45 = vadd.f32 %v2474_v39, %v1425_v44 }
 0x2ab   : > { %1834 = vrcp.f32 %v1554_v43 }
 0x2ac   : > { %v1491_v46 = vadd.f32 %v1490_v6, %v1426_v45 }
 0x2ae   : > { %v1508_v47 = vsub.f32 0.0, %v1491_v46 }
 0x2b0   : > { %v1833_v48 = vpop.eup %1832  ;;  %v1539_v49 = vmul.f32 1.442695, %v1508_v47 }
 0x2b1   : > { %v1835_v50 = vpop.eup %1834  ;;  %v1555_v51 = vadd.f32 1.0, %v1833_v48 }
 0x2b2   : > { %1586 = vst [vmem:[%s2483_s29 + $0x68] sm:$0xff] %v1835_v50  ;;  %1836 = vpow2.f32 %v1539_v49 }
 0x2b3   : > { %1838 = vrcp.f32 %v1555_v51 }
 0x2b8   : > { %v1837_v52 = vpop.eup %1836 }
 0x2b9   : > { %v1839_v53 = vpop.eup %1838  ;;  %v1556_v54 = vadd.f32 1.0, %v1837_v52 }
 0x2ba   : > { %1587 = vst [vmem:[%s2483_s29 + $0x70] sm:$0xff] %v1839_v53 }
 0x2bb   : > { %1840 = vrcp.f32 %v1556_v54 }
 0x2c1   : > { %v1841_v55 = vpop.eup %1840 }
 0x2c2   : > { %1588 = vst [vmem:[%s2483_s29 + $0x78] sm:$0xff] %v1841_v55 }
 0x2c3 PF: > { %s21_s30 = sadd.s32 1, %s1916_s30  }
 0x2c4   : > { %p18_p7 = scmp.ge.s32.totalorder %s21_s30, 4  }
 0x2c6   :  { %20 = sbr.rel (!%p18_p7) target bundleno = 2 (0x2), region = 95 }
 0x2cb   :  { %1611 = vsyncpa [#allocation3], 1 }
 0x2cc   :  { %1613 = vsyncpa [#allocation3 + $0x1], 1 }
 0x2cd   :  { %1614 = vsyncpa [#allocation5], 1 }

</bundles_post_ra>
